<compile_context>
chip_gen: v7x
topology: tpu7x:2x2x1
jax: 0.10.0
libtpu: 0.0.40
codegen_flags: <defaults>
</compile_context>

<pallas_src>
import jax
import jax.numpy as jnp
from jax import lax
from jax.experimental import pallas as pl
from jax.experimental.pallas import tpu as pltpu


# -----------------------------------------------------------------------------
# Pallas kernel: one invocation runs one time-chunk for one batch tile.
# Grid = (batch_tiles, time_chunks); time chunks run sequentially ("arbitrary")
# and carry (h, c) in VMEM scratch; batch tiles are independent ("parallel").
# -----------------------------------------------------------------------------
def lstm_fc_kernel(x_ref,                         # (Tc, Bt, Din)   bf16
                   wih0_ref, whh0_ref, b0_ref,    # (Din,4H),(H,4H) bf16; (1,4H) f32
                   w1_ref, b1_ref,                # (2H,4H) bf16;   (1,4H) f32
                   fcw_ref, fcb_ref,              # (H,O)   bf16;   (1,O)  f32
                   out_ref,                       # (Bt, O) f32
                   gx0_ref,                       # (Tc*Bt, 4H) f32 scratch
                   state_ref):                    # (4, Bt, H) f32 scratch: h0,c0,h1,c1
    Tc, Bt, Din = x_ref.shape
    H = whh0_ref.shape[0]
    cdt = wih0_ref.dtype                          # matmul input dtype (bf16)
    tc = pl.program_id(1)

    # Zero the carried state at the first time-chunk of each batch tile.
    @pl.when(tc == 0)
    def _():
        state_ref[...] = jnp.zeros_like(state_ref)

    # Hoisted layer-0 input projection for the whole chunk: one big matmul,
    # bias b0 folded into its epilogue (off the per-step critical chain).
    x_all = x_ref[...].reshape(Tc * Bt, Din)
    gx0_ref[...] = (jnp.dot(x_all, wih0_ref[...],
                            preferred_element_type=jnp.float32) + b0_ref[...])

    # Grid-invariant weights loaded once per chunk; b1 pre-broadcast once so the
    # (unrolled) loop body does not re-emit broadcast_in_dim every step.
    whh0 = whh0_ref[...]
    w1 = w1_ref[...]
    b1b = jnp.broadcast_to(b1_ref[...], (Bt, 4 * H))

    def cell(gates, c_prev):
        sg = jax.nn.sigmoid(gates)                # one full-width EUP pass
        i = sg[:, 0 * H:1 * H]
        f = sg[:, 1 * H:2 * H]
        o = sg[:, 3 * H:4 * H]
        g = jnp.tanh(gates[:, 2 * H:3 * H])
        c_new = f * c_prev + i * g
        h_new = o * jnp.tanh(c_new)
        return h_new, c_new

    def step(t, carry):
        h0, c0, h1, c1 = carry
        off = pl.multiple_of(t * Bt, Bt)
        # Layer 0: only the recurrent matmul remains on the serial chain.
        g0 = gx0_ref[pl.ds(off, Bt), :] + jnp.dot(
            h0.astype(cdt), whh0, preferred_element_type=jnp.float32)
        h0, c0 = cell(g0, c0)
        # Layer 1: input + recurrent matmuls K-fused (K = 2H = 64).
        hh = jnp.concatenate([h0, h1], axis=-1).astype(cdt)
        g1 = jnp.dot(hh, w1, preferred_element_type=jnp.float32) + b1b
        h1, c1 = cell(g1, c1)
        return (h0, c0, h1, c1)

    carry0 = (state_ref[0], state_ref[1], state_ref[2], state_ref[3])
    # Partial unroll: keeps layer-0(t+1)/layer-1(t) overlap without vreg blow-up.
    h0, c0, h1, c1 = lax.fori_loop(0, Tc, step, carry0, unroll=min(8, Tc))

    # Persist state to the next time-chunk.
    state_ref[0] = h0
    state_ref[1] = c0
    state_ref[2] = h1
    state_ref[3] = c1

    # Fully-connected head on the top layer's last hidden state, final chunk only.
    @pl.when(tc == pl.num_programs(1) - 1)
    def _():
        out_ref[...] = (jnp.dot(h1.astype(cdt), fcw_ref[...],
                                preferred_element_type=jnp.float32)
                        + fcb_ref[...])


# -----------------------------------------------------------------------------
# Tiling heuristics + VMEM budget
# -----------------------------------------------------------------------------
def _pick_batch_tile(batch, *, max_tile=256):
    # Tiles up to 256 rows fill the 256x256 MXU on v6e/v7x; when batch >= 64,
    # prefer an even number of tiles so v7x's two TensorCores both get work.
    if batch < 64:
        return batch
    best = None
    for tile in range(min(batch, max_tile), 31, -1):
        if batch % tile or tile % 8:
            continue
        if (batch // tile) % 2 == 0:
            return tile
        if best is None:
            best = tile
    return best if best is not None else batch


def _pick_time_chunk(seq_len, *, max_chunk=64):
    # Bounds the per-chunk x block + gx0 scratch for v7x's 64 MiB VMEM.
    if seq_len <= max_chunk:
        return seq_len
    for c in range(max_chunk, 0, -1):
        if seq_len % c == 0:
            return c
    return seq_len


def _vmem_bytes_needed(t_chunk, b_tile, input_size, hidden, out_dim, params):
    h4 = 4 * hidden
    x_block = 2 * (t_chunk * b_tile * input_size * 2)     # bf16, double-buffered
    gx0 = t_chunk * b_tile * h4 * 4                        # f32 scratch
    state = 4 * b_tile * hidden * 4
    out_block = 2 * (b_tile * out_dim * 4)
    weights = 2 * sum(int(p.size) * p.dtype.itemsize for p in params.values())
    return x_block + gx0 + state + out_block + weights


# -----------------------------------------------------------------------------
# Wrapper
# -----------------------------------------------------------------------------
def lstm_model_forward(x, params, *, time_major=False, b_tile=None, t_chunk=None):
    cdt = params["wih0"].dtype
    if time_major:
        T, B, Din = x.shape
        x_tbd = x.astype(cdt)
    else:
        B, T, Din = x.shape
        x_tbd = jnp.transpose(x, (1, 0, 2)).astype(cdt)     # (T, B, Din)

    H = params["whh0"].shape[0]
    out_dim = params["fcw"].shape[-1]

    if b_tile is None:
        b_tile = _pick_batch_tile(B)
    # TODO(synk): no masking path for a ragged last batch tile.
    assert B % b_tile == 0, "batch must be a multiple of the batch tile"
    nb = B // b_tile

    if t_chunk is None:
        t_chunk = _pick_time_chunk(T)
    assert T % t_chunk == 0, "seq length must be a multiple of the time chunk"
    ntc = T // t_chunk

    def wspec(a):
        # Grid-invariant weight block (constant index map -> fetched once).
        # On v7x at very large H, pipeline_mode=pl.Buffered(1) would single-
        # buffer these to save VMEM; unnecessary at these sizes.
        return pl.BlockSpec(a.shape, lambda b, t: (0,) * a.ndim)

    grid_spec = pltpu.PrefetchScalarGridSpec(
        num_scalar_prefetch=0,
        grid=(nb, ntc),
        in_specs=[
            pl.BlockSpec((t_chunk, b_tile, Din), lambda b, t: (t, b, 0)),
            wspec(params["wih0"]), wspec(params["whh0"]), wspec(params["b0"]),
            wspec(params["w1"]), wspec(params["b1"]),
            wspec(params["fcw"]), wspec(params["fcb"]),
        ],
        out_specs=pl.BlockSpec((b_tile, out_dim), lambda b, t: (b, 0)),
        scratch_shapes=[
            pltpu.VMEM((t_chunk * b_tile, 4 * H), jnp.float32),  # hoisted gx0
            pltpu.VMEM((4, b_tile, H), jnp.float32),             # h0,c0,h1,c1 carry
        ],
    )

    compiler_kwargs = dict(dimension_semantics=("parallel", "arbitrary"))
    need = _vmem_bytes_needed(t_chunk, b_tile, Din, H, out_dim, params)
    if need > 24 * (1 << 20):
        # Raise scoped VMEM only when needed; keep under v7x's 64 MiB physical.
        compiler_kwargs["vmem_limit_bytes"] = min(int(need * 1.25), 56 * (1 << 20))

    return pl.pallas_call(
        lstm_fc_kernel,
        out_shape=jax.ShapeDtypeStruct((B, out_dim), jnp.float32),
        grid_spec=grid_spec,
        compiler_params=pltpu.CompilerParams(**compiler_kwargs),
    )(x_tbd,
      params["wih0"], params["whh0"], params["b0"],
      params["w1"], params["b1"],
      params["fcw"], params["fcb"])


# -----------------------------------------------------------------------------
# Deterministic parameter init (PyTorch nn.LSTM / nn.Linear layout, uniform
# +-1/sqrt(H)), restacked into the fused kernel layout.  Gate order along the
# 4H lane axis stays PyTorch's i|f|g|o.
# -----------------------------------------------------------------------------
def init_params(key, input_size, hidden_size, channels,
                compute_dtype=jnp.bfloat16):
    H = hidden_size
    bound = float(H) ** -0.5
    ks = jax.random.split(key, 10)

    def u(k, shape):
        return jax.random.uniform(k, shape, jnp.float32, -bound, bound)

    # PyTorch-layout tensors (rows in gate order i, f, g, o).
    w_ih_l0 = u(ks[0], (4 * H, input_size))
    w_hh_l0 = u(ks[1], (4 * H, H))
    b_ih_l0 = u(ks[2], (4 * H,))
    b_hh_l0 = u(ks[3], (4 * H,))
    w_ih_l1 = u(ks[4], (4 * H, H))
    w_hh_l1 = u(ks[5], (4 * H, H))
    b_ih_l1 = u(ks[6], (4 * H,))
    b_hh_l1 = u(ks[7], (4 * H,))
    fc_w = u(ks[8], (H * channels, H))
    fc_b = u(ks[9], (H * channels,))

    return dict(
        wih0=jnp.transpose(w_ih_l0).astype(compute_dtype),            # (Din, 4H)
        whh0=jnp.transpose(w_hh_l0).astype(compute_dtype),            # (H, 4H)
        b0=(b_ih_l0 + b_hh_l0).reshape(1, 4 * H),                     # f32
        # Layer-1 input + recurrent weights K-stacked: rows 0..H-1 act on h0
        # (input to layer 1), rows H..2H-1 act on h1_prev (recurrent).
        w1=jnp.concatenate([jnp.transpose(w_ih_l1),
                            jnp.transpose(w_hh_l1)], axis=0
                           ).astype(compute_dtype),                    # (2H, 4H)
        b1=(b_ih_l1 + b_hh_l1).reshape(1, 4 * H),                     # f32
        fcw=jnp.transpose(fc_w).astype(compute_dtype),                # (H, H*ch)
        fcb=fc_b.reshape(1, H * channels),                            # f32
    )


# -----------------------------------------------------------------------------
# Pure-JAX reference with identical math (bf16 matmul inputs, f32 accumulation),
# written in the un-fused (PyTorch-style split matmul) form as a cross-check
# that the hoist / K-fusion preserved semantics.
# -----------------------------------------------------------------------------
def reference_forward(x, p):
    cdt = p["wih0"].dtype
    B, T, Din = x.shape
    H = p["whh0"].shape[0]
    xt = jnp.transpose(x, (1, 0, 2)).astype(cdt)   # (T, B, Din)
    wih1 = p["w1"][:H]
    whh1 = p["w1"][H:]

    def cell(gates, c):
        sg = jax.nn.sigmoid(gates)
        i, f, o = sg[:, :H], sg[:, H:2 * H], sg[:, 3 * H:]
        g = jnp.tanh(gates[:, 2 * H:3 * H])
        c = f * c + i * g
        h = o * jnp.tanh(c)
        return h, c

    def step(carry, x_t):
        h0, c0, h1, c1 = carry
        g0 = (jnp.dot(x_t, p["wih0"], preferred_element_type=jnp.float32)
              + jnp.dot(h0.astype(cdt), p["whh0"],
                        preferred_element_type=jnp.float32)
              + p["b0"])
        h0, c0 = cell(g0, c0)
        g1 = (jnp.dot(h0.astype(cdt), wih1, preferred_element_type=jnp.float32)
              + jnp.dot(h1.astype(cdt), whh1, preferred_element_type=jnp.float32)
              + p["b1"])
        h1, c1 = cell(g1, c1)
        return (h0, c0, h1, c1), None

    zeros = jnp.zeros((B, H), jnp.float32)
    (_, _, h1, _), _ = lax.scan(step, (zeros, zeros, zeros, zeros), xt)
    return (jnp.dot(h1.astype(cdt), p["fcw"],
                    preferred_element_type=jnp.float32) + p["fcb"])


if __name__ == "__main__":
    # x: (batch, seq, input_size); out: (batch, hidden_size * channels)
    batch, seq, input_size, hidden_size, channels = 8, 8, 16, 32, 4

    key = jax.random.PRNGKey(0)
    k_x, k_p = jax.random.split(key)
    x = jax.random.normal(k_x, (batch, seq, input_size), jnp.float32)
    params = init_params(k_p, input_size, hidden_size, channels)

    out = jax.block_until_ready(lstm_model_forward(x, params))
    ref = jax.block_until_ready(reference_forward(x, params))

    assert out.shape == (batch, hidden_size * channels)
    assert jnp.allclose(out, ref, rtol=2e-3, atol=2e-3), "mismatch vs JAX reference"

    print("KERNEL_OK")
</pallas_src>

<mosaic_0001>
module attributes {stable_mosaic.version = 11 : i64} {
  func.func @lstm_fc_kernel(%arg0: i32, %arg1: i32, %arg2: memref<8x8x16xbf16, #tpu.memory_space<vmem>>, %arg3: memref<16x128xbf16, #tpu.memory_space<vmem>>, %arg4: memref<32x128xbf16, #tpu.memory_space<vmem>>, %arg5: memref<1x128xf32, #tpu.memory_space<vmem>>, %arg6: memref<64x128xbf16, #tpu.memory_space<vmem>>, %arg7: memref<1x128xf32, #tpu.memory_space<vmem>>, %arg8: memref<32x128xbf16, #tpu.memory_space<vmem>>, %arg9: memref<1x128xf32, #tpu.memory_space<vmem>>, %arg10: memref<8x128xf32, #tpu.memory_space<vmem>>, %arg11: memref<64x128xf32, #tpu.memory_space<vmem>>, %arg12: memref<4x8x32xf32, #tpu.memory_space<vmem>>) attributes {dimension_semantics = [#tpu.dimension_semantics<parallel>, #tpu.dimension_semantics<arbitrary>], iteration_bounds = array<i64: 1, 1>, scalar_prefetch = 0 : i64, scratch_operands = 2 : i64, tpu.core_type = #tpu.core_type<tc>, window_params = [{transform_indices = @transform_0, window_bounds = array<i64: 8, 8, 16>}, {pipeline_mode = #tpu.pipeline_mode<synchronous>, transform_indices = @transform_1, window_bounds = array<i64: 16, 128>}, {pipeline_mode = #tpu.pipeline_mode<synchronous>, transform_indices = @transform_2, window_bounds = array<i64: 32, 128>}, {pipeline_mode = #tpu.pipeline_mode<synchronous>, transform_indices = @transform_3, window_bounds = array<i64: 1, 128>}, {pipeline_mode = #tpu.pipeline_mode<synchronous>, transform_indices = @transform_4, window_bounds = array<i64: 64, 128>}, {pipeline_mode = #tpu.pipeline_mode<synchronous>, transform_indices = @transform_5, window_bounds = array<i64: 1, 128>}, {pipeline_mode = #tpu.pipeline_mode<synchronous>, transform_indices = @transform_6, window_bounds = array<i64: 32, 128>}, {pipeline_mode = #tpu.pipeline_mode<synchronous>, transform_indices = @transform_7, window_bounds = array<i64: 1, 128>}, {transform_indices = @transform_8, window_bounds = array<i64: 8, 128>}]} {
    %c0_i32 = arith.constant 0 : i32
    %0 = arith.cmpi eq, %arg1, %c0_i32 : i32
    %1 = arith.extui %0 : i1 to i32
    %c0_i32_0 = arith.constant 0 : i32
    %2 = arith.cmpi ne, %1, %c0_i32_0 : i32
    scf.if %2 {
      %cst_87 = arith.constant 0.000000e+00 : f32
      %367 = vector.broadcast %cst_87 : f32 to vector<4x8x32xf32>
      %c0_88 = arith.constant 0 : index
      %c0_89 = arith.constant 0 : index
      %c0_90 = arith.constant 0 : index
      %368 = vector.load %arg12[%c0_88, %c0_89, %c0_90] : memref<4x8x32xf32, #tpu.memory_space<vmem>>, vector<4x8x32xf32>
      tpu.vector_store %arg12[%c0_88, %c0_89, %c0_90], %367 {strides = array<i32>} : memref<4x8x32xf32, #tpu.memory_space<vmem>>, vector<4x8x32xf32>,
    } else {
    }
    %c0 = arith.constant 0 : index
    %c0_1 = arith.constant 0 : index
    %c0_2 = arith.constant 0 : index
    %3 = vector.load %arg2[%c0, %c0_1, %c0_2] : memref<8x8x16xbf16, #tpu.memory_space<vmem>>, vector<8x8x16xbf16>
    %4 = vector.shape_cast %3 : vector<8x8x16xbf16> to vector<64x16xbf16>
    %c0_3 = arith.constant 0 : index
    %c0_4 = arith.constant 0 : index
    %5 = vector.load %arg3[%c0_3, %c0_4] : memref<16x128xbf16, #tpu.memory_space<vmem>>, vector<16x128xbf16>
    %cst = arith.constant dense<0.000000e+00> : vector<64x128xf32>
    %6 = tpu.matmul %4, %5, %cst {dimension_numbers = #tpu.dot_dimension_numbers<[1], [0], [0], [1], [0, 0, 1, 1], [], []>} : vector<64x16xbf16>, vector<16x128xbf16>, vector<64x128xf32> -> vector<64x128xf32>
    %c0_5 = arith.constant 0 : index
    %c0_6 = arith.constant 0 : index
    %7 = vector.load %arg5[%c0_5, %c0_6] : memref<1x128xf32, #tpu.memory_space<vmem>>, vector<1x128xf32>
    %8 = vector.broadcast %7 : vector<1x128xf32> to vector<64x128xf32>
    %9 = arith.addf %6, %8 : vector<64x128xf32>
    %c0_7 = arith.constant 0 : index
    %c0_8 = arith.constant 0 : index
    %10 = vector.load %arg11[%c0_7, %c0_8] : memref<64x128xf32, #tpu.memory_space<vmem>>, vector<64x128xf32>
    tpu.vector_store %arg11[%c0_7, %c0_8], %9 {strides = array<i32>} : memref<64x128xf32, #tpu.memory_space<vmem>>, vector<64x128xf32>,
    %c0_9 = arith.constant 0 : index
    %c0_10 = arith.constant 0 : index
    %11 = vector.load %arg4[%c0_9, %c0_10] : memref<32x128xbf16, #tpu.memory_space<vmem>>, vector<32x128xbf16>
    %c0_11 = arith.constant 0 : index
    %c0_12 = arith.constant 0 : index
    %12 = vector.load %arg6[%c0_11, %c0_12] : memref<64x128xbf16, #tpu.memory_space<vmem>>, vector<64x128xbf16>
    %c0_13 = arith.constant 0 : index
    %c0_14 = arith.constant 0 : index
    %13 = vector.load %arg7[%c0_13, %c0_14] : memref<1x128xf32, #tpu.memory_space<vmem>>, vector<1x128xf32>
    %14 = vector.shape_cast %13 : vector<1x128xf32> to vector<1x128xf32>
    %15 = vector.broadcast %14 : vector<1x128xf32> to vector<8x128xf32>
    %c0_15 = arith.constant 0 : index
    %c0_16 = arith.constant 0 : index
    %c0_17 = arith.constant 0 : index
    %16 = vector.load %arg12[%c0_15, %c0_16, %c0_17] : memref<4x8x32xf32, #tpu.memory_space<vmem>>, vector<1x8x32xf32>
    %17 = vector.shape_cast %16 : vector<1x8x32xf32> to vector<8x32xf32>
    %c1 = arith.constant 1 : index
    %c0_18 = arith.constant 0 : index
    %c0_19 = arith.constant 0 : index
    %18 = vector.load %arg12[%c1, %c0_18, %c0_19] : memref<4x8x32xf32, #tpu.memory_space<vmem>>, vector<1x8x32xf32>
    %19 = vector.shape_cast %18 : vector<1x8x32xf32> to vector<8x32xf32>
    %c2 = arith.constant 2 : index
    %c0_20 = arith.constant 0 : index
    %c0_21 = arith.constant 0 : index
    %20 = vector.load %arg12[%c2, %c0_20, %c0_21] : memref<4x8x32xf32, #tpu.memory_space<vmem>>, vector<1x8x32xf32>
    %21 = vector.shape_cast %20 : vector<1x8x32xf32> to vector<8x32xf32>
    %c3 = arith.constant 3 : index
    %c0_22 = arith.constant 0 : index
    %c0_23 = arith.constant 0 : index
    %22 = vector.load %arg12[%c3, %c0_22, %c0_23] : memref<4x8x32xf32, #tpu.memory_space<vmem>>, vector<1x8x32xf32>
    %23 = vector.shape_cast %22 : vector<1x8x32xf32> to vector<8x32xf32>
    %c0_i32_24 = arith.constant 0 : i32
    %c8_i32 = arith.constant 8 : i32
    %24 = arith.muli %c0_i32_24, %c8_i32 : i32
    %25 = tpu.assume_multiple %24, 8 : i32
    %26 = arith.index_cast %25 : i32 to index
    %c0_25 = arith.constant 0 : index
    %27 = vector.load %arg11[%26, %c0_25] : memref<64x128xf32, #tpu.memory_space<vmem>>, vector<8x128xf32>
    %28 = arith.truncf %17 : vector<8x32xf32> to vector<8x32xbf16>
    %cst_26 = arith.constant dense<0.000000e+00> : vector<8x128xf32>
    %29 = tpu.matmul %28, %11, %cst_26 {dimension_numbers = #tpu.dot_dimension_numbers<[1], [0], [0], [1], [0, 0, 1, 1], [], []>} : vector<8x32xbf16>, vector<32x128xbf16>, vector<8x128xf32> -> vector<8x128xf32>
    %30 = arith.addf %27, %29 : vector<8x128xf32>
    %31 = arith.negf %30 : vector<8x128xf32>
    %32 = math.exp %31 : vector<8x128xf32>
    %cst_27 = arith.constant 1.000000e+00 : f32
    %33 = vector.broadcast %cst_27 : f32 to vector<8x128xf32>
    %34 = arith.addf %33, %32 : vector<8x128xf32>
    %35 = arith.divf %33, %34 : vector<8x128xf32>
    %36 = vector.extract_strided_slice %35 {offsets = [0, 0], sizes = [8, 32], strides = [1, 1]} : vector<8x128xf32> to vector<8x32xf32>
    %37 = vector.extract_strided_slice %35 {offsets = [0, 32], sizes = [8, 32], strides = [1, 1]} : vector<8x128xf32> to vector<8x32xf32>
    %38 = vector.extract_strided_slice %35 {offsets = [0, 96], sizes = [8, 32], strides = [1, 1]} : vector<8x128xf32> to vector<8x32xf32>
    %39 = vector.extract_strided_slice %30 {offsets = [0, 64], sizes = [8, 32], strides = [1, 1]} : vector<8x128xf32> to vector<8x32xf32>
    %40 = math.tanh %39 : vector<8x32xf32>
    %41 = arith.mulf %37, %19 : vector<8x32xf32>
    %42 = arith.mulf %36, %40 : vector<8x32xf32>
    %43 = arith.addf %41, %42 : vector<8x32xf32>
    %44 = math.tanh %43 : vector<8x32xf32>
    %45 = arith.mulf %38, %44 : vector<8x32xf32>
    %46 = tpu.concatenate %45, %21 in 1 : vector<8x32xf32>, vector<8x32xf32> -> vector<8x64xf32>
    %47 = arith.truncf %46 : vector<8x64xf32> to vector<8x64xbf16>
    %cst_28 = arith.constant dense<0.000000e+00> : vector<8x128xf32>
    %48 = tpu.matmul %47, %12, %cst_28 {dimension_numbers = #tpu.dot_dimension_numbers<[1], [0], [0], [1], [0, 0, 1, 1], [], []>} : vector<8x64xbf16>, vector<64x128xbf16>, vector<8x128xf32> -> vector<8x128xf32>
    %49 = arith.addf %48, %15 : vector<8x128xf32>
    %50 = arith.negf %49 : vector<8x128xf32>
    %51 = math.exp %50 : vector<8x128xf32>
    %cst_29 = arith.constant 1.000000e+00 : f32
    %52 = vector.broadcast %cst_29 : f32 to vector<8x128xf32>
    %53 = arith.addf %52, %51 : vector<8x128xf32>
    %54 = arith.divf %52, %53 : vector<8x128xf32>
    %55 = vector.extract_strided_slice %54 {offsets = [0, 0], sizes = [8, 32], strides = [1, 1]} : vector<8x128xf32> to vector<8x32xf32>
    %56 = vector.extract_strided_slice %54 {offsets = [0, 32], sizes = [8, 32], strides = [1, 1]} : vector<8x128xf32> to vector<8x32xf32>
    %57 = vector.extract_strided_slice %54 {offsets = [0, 96], sizes = [8, 32], strides = [1, 1]} : vector<8x128xf32> to vector<8x32xf32>
    %58 = vector.extract_strided_slice %49 {offsets = [0, 64], sizes = [8, 32], strides = [1, 1]} : vector<8x128xf32> to vector<8x32xf32>
    %59 = math.tanh %58 : vector<8x32xf32>
    %60 = arith.mulf %56, %23 : vector<8x32xf32>
    %61 = arith.mulf %55, %59 : vector<8x32xf32>
    %62 = arith.addf %60, %61 : vector<8x32xf32>
    %63 = math.tanh %62 : vector<8x32xf32>
    %64 = arith.mulf %57, %63 : vector<8x32xf32>
    %c1_i32 = arith.constant 1 : i32
    %c8_i32_30 = arith.constant 8 : i32
    %65 = arith.muli %c1_i32, %c8_i32_30 : i32
    %66 = tpu.assume_multiple %65, 8 : i32
    %67 = arith.index_cast %66 : i32 to index
    %c0_31 = arith.constant 0 : index
    %68 = vector.load %arg11[%67, %c0_31] : memref<64x128xf32, #tpu.memory_space<vmem>>, vector<8x128xf32>
    %69 = arith.truncf %45 : vector<8x32xf32> to vector<8x32xbf16>
    %cst_32 = arith.constant dense<0.000000e+00> : vector<8x128xf32>
    %70 = tpu.matmul %69, %11, %cst_32 {dimension_numbers = #tpu.dot_dimension_numbers<[1], [0], [0], [1], [0, 0, 1, 1], [], []>} : vector<8x32xbf16>, vector<32x128xbf16>, vector<8x128xf32> -> vector<8x128xf32>
    %71 = arith.addf %68, %70 : vector<8x128xf32>
    %72 = arith.negf %71 : vector<8x128xf32>
    %73 = math.exp %72 : vector<8x128xf32>
    %cst_33 = arith.constant 1.000000e+00 : f32
    %74 = vector.broadcast %cst_33 : f32 to vector<8x128xf32>
    %75 = arith.addf %74, %73 : vector<8x128xf32>
    %76 = arith.divf %74, %75 : vector<8x128xf32>
    %77 = vector.extract_strided_slice %76 {offsets = [0, 0], sizes = [8, 32], strides = [1, 1]} : vector<8x128xf32> to vector<8x32xf32>
    %78 = vector.extract_strided_slice %76 {offsets = [0, 32], sizes = [8, 32], strides = [1, 1]} : vector<8x128xf32> to vector<8x32xf32>
    %79 = vector.extract_strided_slice %76 {offsets = [0, 96], sizes = [8, 32], strides = [1, 1]} : vector<8x128xf32> to vector<8x32xf32>
    %80 = vector.extract_strided_slice %71 {offsets = [0, 64], sizes = [8, 32], strides = [1, 1]} : vector<8x128xf32> to vector<8x32xf32>
    %81 = math.tanh %80 : vector<8x32xf32>
    %82 = arith.mulf %78, %43 : vector<8x32xf32>
    %83 = arith.mulf %77, %81 : vector<8x32xf32>
    %84 = arith.addf %82, %83 : vector<8x32xf32>
    %85 = math.tanh %84 : vector<8x32xf32>
    %86 = arith.mulf %79, %85 : vector<8x32xf32>
    %87 = tpu.concatenate %86, %64 in 1 : vector<8x32xf32>, vector<8x32xf32> -> vector<8x64xf32>
    %88 = arith.truncf %87 : vector<8x64xf32> to vector<8x64xbf16>
    %cst_34 = arith.constant dense<0.000000e+00> : vector<8x128xf32>
    %89 = tpu.matmul %88, %12, %cst_34 {dimension_numbers = #tpu.dot_dimension_numbers<[1], [0], [0], [1], [0, 0, 1, 1], [], []>} : vector<8x64xbf16>, vector<64x128xbf16>, vector<8x128xf32> -> vector<8x128xf32>
    %90 = arith.addf %89, %15 : vector<8x128xf32>
    %91 = arith.negf %90 : vector<8x128xf32>
    %92 = math.exp %91 : vector<8x128xf32>
    %cst_35 = arith.constant 1.000000e+00 : f32
    %93 = vector.broadcast %cst_35 : f32 to vector<8x128xf32>
    %94 = arith.addf %93, %92 : vector<8x128xf32>
    %95 = arith.divf %93, %94 : vector<8x128xf32>
    %96 = vector.extract_strided_slice %95 {offsets = [0, 0], sizes = [8, 32], strides = [1, 1]} : vector<8x128xf32> to vector<8x32xf32>
    %97 = vector.extract_strided_slice %95 {offsets = [0, 32], sizes = [8, 32], strides = [1, 1]} : vector<8x128xf32> to vector<8x32xf32>
    %98 = vector.extract_strided_slice %95 {offsets = [0, 96], sizes = [8, 32], strides = [1, 1]} : vector<8x128xf32> to vector<8x32xf32>
    %99 = vector.extract_strided_slice %90 {offsets = [0, 64], sizes = [8, 32], strides = [1, 1]} : vector<8x128xf32> to vector<8x32xf32>
    %100 = math.tanh %99 : vector<8x32xf32>
    %101 = arith.mulf %97, %62 : vector<8x32xf32>
    %102 = arith.mulf %96, %100 : vector<8x32xf32>
    %103 = arith.addf %101, %102 : vector<8x32xf32>
    %104 = math.tanh %103 : vector<8x32xf32>
    %105 = arith.mulf %98, %104 : vector<8x32xf32>
    %c2_i32 = arith.constant 2 : i32
    %c8_i32_36 = arith.constant 8 : i32
    %106 = arith.muli %c2_i32, %c8_i32_36 : i32
    %107 = tpu.assume_multiple %106, 8 : i32
    %108 = arith.index_cast %107 : i32 to index
    %c0_37 = arith.constant 0 : index
    %109 = vector.load %arg11[%108, %c0_37] : memref<64x128xf32, #tpu.memory_space<vmem>>, vector<8x128xf32>
    %110 = arith.truncf %86 : vector<8x32xf32> to vector<8x32xbf16>
    %cst_38 = arith.constant dense<0.000000e+00> : vector<8x128xf32>
    %111 = tpu.matmul %110, %11, %cst_38 {dimension_numbers = #tpu.dot_dimension_numbers<[1], [0], [0], [1], [0, 0, 1, 1], [], []>} : vector<8x32xbf16>, vector<32x128xbf16>, vector<8x128xf32> -> vector<8x128xf32>
    %112 = arith.addf %109, %111 : vector<8x128xf32>
    %113 = arith.negf %112 : vector<8x128xf32>
    %114 = math.exp %113 : vector<8x128xf32>
    %cst_39 = arith.constant 1.000000e+00 : f32
    %115 = vector.broadcast %cst_39 : f32 to vector<8x128xf32>
    %116 = arith.addf %115, %114 : vector<8x128xf32>
    %117 = arith.divf %115, %116 : vector<8x128xf32>
    %118 = vector.extract_strided_slice %117 {offsets = [0, 0], sizes = [8, 32], strides = [1, 1]} : vector<8x128xf32> to vector<8x32xf32>
    %119 = vector.extract_strided_slice %117 {offsets = [0, 32], sizes = [8, 32], strides = [1, 1]} : vector<8x128xf32> to vector<8x32xf32>
    %120 = vector.extract_strided_slice %117 {offsets = [0, 96], sizes = [8, 32], strides = [1, 1]} : vector<8x128xf32> to vector<8x32xf32>
    %121 = vector.extract_strided_slice %112 {offsets = [0, 64], sizes = [8, 32], strides = [1, 1]} : vector<8x128xf32> to vector<8x32xf32>
    %122 = math.tanh %121 : vector<8x32xf32>
    %123 = arith.mulf %119, %84 : vector<8x32xf32>
    %124 = arith.mulf %118, %122 : vector<8x32xf32>
    %125 = arith.addf %123, %124 : vector<8x32xf32>
    %126 = math.tanh %125 : vector<8x32xf32>
    %127 = arith.mulf %120, %126 : vector<8x32xf32>
    %128 = tpu.concatenate %127, %105 in 1 : vector<8x32xf32>, vector<8x32xf32> -> vector<8x64xf32>
    %129 = arith.truncf %128 : vector<8x64xf32> to vector<8x64xbf16>
    %cst_40 = arith.constant dense<0.000000e+00> : vector<8x128xf32>
    %130 = tpu.matmul %129, %12, %cst_40 {dimension_numbers = #tpu.dot_dimension_numbers<[1], [0], [0], [1], [0, 0, 1, 1], [], []>} : vector<8x64xbf16>, vector<64x128xbf16>, vector<8x128xf32> -> vector<8x128xf32>
    %131 = arith.addf %130, %15 : vector<8x128xf32>
    %132 = arith.negf %131 : vector<8x128xf32>
    %133 = math.exp %132 : vector<8x128xf32>
    %cst_41 = arith.constant 1.000000e+00 : f32
    %134 = vector.broadcast %cst_41 : f32 to vector<8x128xf32>
    %135 = arith.addf %134, %133 : vector<8x128xf32>
    %136 = arith.divf %134, %135 : vector<8x128xf32>
    %137 = vector.extract_strided_slice %136 {offsets = [0, 0], sizes = [8, 32], strides = [1, 1]} : vector<8x128xf32> to vector<8x32xf32>
    %138 = vector.extract_strided_slice %136 {offsets = [0, 32], sizes = [8, 32], strides = [1, 1]} : vector<8x128xf32> to vector<8x32xf32>
    %139 = vector.extract_strided_slice %136 {offsets = [0, 96], sizes = [8, 32], strides = [1, 1]} : vector<8x128xf32> to vector<8x32xf32>
    %140 = vector.extract_strided_slice %131 {offsets = [0, 64], sizes = [8, 32], strides = [1, 1]} : vector<8x128xf32> to vector<8x32xf32>
    %141 = math.tanh %140 : vector<8x32xf32>
    %142 = arith.mulf %138, %103 : vector<8x32xf32>
    %143 = arith.mulf %137, %141 : vector<8x32xf32>
    %144 = arith.addf %142, %143 : vector<8x32xf32>
    %145 = math.tanh %144 : vector<8x32xf32>
    %146 = arith.mulf %139, %145 : vector<8x32xf32>
    %c3_i32 = arith.constant 3 : i32
    %c8_i32_42 = arith.constant 8 : i32
    %147 = arith.muli %c3_i32, %c8_i32_42 : i32
    %148 = tpu.assume_multiple %147, 8 : i32
    %149 = arith.index_cast %148 : i32 to index
    %c0_43 = arith.constant 0 : index
    %150 = vector.load %arg11[%149, %c0_43] : memref<64x128xf32, #tpu.memory_space<vmem>>, vector<8x128xf32>
    %151 = arith.truncf %127 : vector<8x32xf32> to vector<8x32xbf16>
    %cst_44 = arith.constant dense<0.000000e+00> : vector<8x128xf32>
    %152 = tpu.matmul %151, %11, %cst_44 {dimension_numbers = #tpu.dot_dimension_numbers<[1], [0], [0], [1], [0, 0, 1, 1], [], []>} : vector<8x32xbf16>, vector<32x128xbf16>, vector<8x128xf32> -> vector<8x128xf32>
    %153 = arith.addf %150, %152 : vector<8x128xf32>
    %154 = arith.negf %153 : vector<8x128xf32>
    %155 = math.exp %154 : vector<8x128xf32>
    %cst_45 = arith.constant 1.000000e+00 : f32
    %156 = vector.broadcast %cst_45 : f32 to vector<8x128xf32>
    %157 = arith.addf %156, %155 : vector<8x128xf32>
    %158 = arith.divf %156, %157 : vector<8x128xf32>
    %159 = vector.extract_strided_slice %158 {offsets = [0, 0], sizes = [8, 32], strides = [1, 1]} : vector<8x128xf32> to vector<8x32xf32>
    %160 = vector.extract_strided_slice %158 {offsets = [0, 32], sizes = [8, 32], strides = [1, 1]} : vector<8x128xf32> to vector<8x32xf32>
    %161 = vector.extract_strided_slice %158 {offsets = [0, 96], sizes = [8, 32], strides = [1, 1]} : vector<8x128xf32> to vector<8x32xf32>
    %162 = vector.extract_strided_slice %153 {offsets = [0, 64], sizes = [8, 32], strides = [1, 1]} : vector<8x128xf32> to vector<8x32xf32>
    %163 = math.tanh %162 : vector<8x32xf32>
    %164 = arith.mulf %160, %125 : vector<8x32xf32>
    %165 = arith.mulf %159, %163 : vector<8x32xf32>
    %166 = arith.addf %164, %165 : vector<8x32xf32>
    %167 = math.tanh %166 : vector<8x32xf32>
    %168 = arith.mulf %161, %167 : vector<8x32xf32>
    %169 = tpu.concatenate %168, %146 in 1 : vector<8x32xf32>, vector<8x32xf32> -> vector<8x64xf32>
    %170 = arith.truncf %169 : vector<8x64xf32> to vector<8x64xbf16>
    %cst_46 = arith.constant dense<0.000000e+00> : vector<8x128xf32>
    %171 = tpu.matmul %170, %12, %cst_46 {dimension_numbers = #tpu.dot_dimension_numbers<[1], [0], [0], [1], [0, 0, 1, 1], [], []>} : vector<8x64xbf16>, vector<64x128xbf16>, vector<8x128xf32> -> vector<8x128xf32>
    %172 = arith.addf %171, %15 : vector<8x128xf32>
    %173 = arith.negf %172 : vector<8x128xf32>
    %174 = math.exp %173 : vector<8x128xf32>
    %cst_47 = arith.constant 1.000000e+00 : f32
    %175 = vector.broadcast %cst_47 : f32 to vector<8x128xf32>
    %176 = arith.addf %175, %174 : vector<8x128xf32>
    %177 = arith.divf %175, %176 : vector<8x128xf32>
    %178 = vector.extract_strided_slice %177 {offsets = [0, 0], sizes = [8, 32], strides = [1, 1]} : vector<8x128xf32> to vector<8x32xf32>
    %179 = vector.extract_strided_slice %177 {offsets = [0, 32], sizes = [8, 32], strides = [1, 1]} : vector<8x128xf32> to vector<8x32xf32>
    %180 = vector.extract_strided_slice %177 {offsets = [0, 96], sizes = [8, 32], strides = [1, 1]} : vector<8x128xf32> to vector<8x32xf32>
    %181 = vector.extract_strided_slice %172 {offsets = [0, 64], sizes = [8, 32], strides = [1, 1]} : vector<8x128xf32> to vector<8x32xf32>
    %182 = math.tanh %181 : vector<8x32xf32>
    %183 = arith.mulf %179, %144 : vector<8x32xf32>
    %184 = arith.mulf %178, %182 : vector<8x32xf32>
    %185 = arith.addf %183, %184 : vector<8x32xf32>
    %186 = math.tanh %185 : vector<8x32xf32>
    %187 = arith.mulf %180, %186 : vector<8x32xf32>
    %c4_i32 = arith.constant 4 : i32
    %c8_i32_48 = arith.constant 8 : i32
    %188 = arith.muli %c4_i32, %c8_i32_48 : i32
    %189 = tpu.assume_multiple %188, 8 : i32
    %190 = arith.index_cast %189 : i32 to index
    %c0_49 = arith.constant 0 : index
    %191 = vector.load %arg11[%190, %c0_49] : memref<64x128xf32, #tpu.memory_space<vmem>>, vector<8x128xf32>
    %192 = arith.truncf %168 : vector<8x32xf32> to vector<8x32xbf16>
    %cst_50 = arith.constant dense<0.000000e+00> : vector<8x128xf32>
    %193 = tpu.matmul %192, %11, %cst_50 {dimension_numbers = #tpu.dot_dimension_numbers<[1], [0], [0], [1], [0, 0, 1, 1], [], []>} : vector<8x32xbf16>, vector<32x128xbf16>, vector<8x128xf32> -> vector<8x128xf32>
    %194 = arith.addf %191, %193 : vector<8x128xf32>
    %195 = arith.negf %194 : vector<8x128xf32>
    %196 = math.exp %195 : vector<8x128xf32>
    %cst_51 = arith.constant 1.000000e+00 : f32
    %197 = vector.broadcast %cst_51 : f32 to vector<8x128xf32>
    %198 = arith.addf %197, %196 : vector<8x128xf32>
    %199 = arith.divf %197, %198 : vector<8x128xf32>
    %200 = vector.extract_strided_slice %199 {offsets = [0, 0], sizes = [8, 32], strides = [1, 1]} : vector<8x128xf32> to vector<8x32xf32>
    %201 = vector.extract_strided_slice %199 {offsets = [0, 32], sizes = [8, 32], strides = [1, 1]} : vector<8x128xf32> to vector<8x32xf32>
    %202 = vector.extract_strided_slice %199 {offsets = [0, 96], sizes = [8, 32], strides = [1, 1]} : vector<8x128xf32> to vector<8x32xf32>
    %203 = vector.extract_strided_slice %194 {offsets = [0, 64], sizes = [8, 32], strides = [1, 1]} : vector<8x128xf32> to vector<8x32xf32>
    %204 = math.tanh %203 : vector<8x32xf32>
    %205 = arith.mulf %201, %166 : vector<8x32xf32>
    %206 = arith.mulf %200, %204 : vector<8x32xf32>
    %207 = arith.addf %205, %206 : vector<8x32xf32>
    %208 = math.tanh %207 : vector<8x32xf32>
    %209 = arith.mulf %202, %208 : vector<8x32xf32>
    %210 = tpu.concatenate %209, %187 in 1 : vector<8x32xf32>, vector<8x32xf32> -> vector<8x64xf32>
    %211 = arith.truncf %210 : vector<8x64xf32> to vector<8x64xbf16>
    %cst_52 = arith.constant dense<0.000000e+00> : vector<8x128xf32>
    %212 = tpu.matmul %211, %12, %cst_52 {dimension_numbers = #tpu.dot_dimension_numbers<[1], [0], [0], [1], [0, 0, 1, 1], [], []>} : vector<8x64xbf16>, vector<64x128xbf16>, vector<8x128xf32> -> vector<8x128xf32>
    %213 = arith.addf %212, %15 : vector<8x128xf32>
    %214 = arith.negf %213 : vector<8x128xf32>
    %215 = math.exp %214 : vector<8x128xf32>
    %cst_53 = arith.constant 1.000000e+00 : f32
    %216 = vector.broadcast %cst_53 : f32 to vector<8x128xf32>
    %217 = arith.addf %216, %215 : vector<8x128xf32>
    %218 = arith.divf %216, %217 : vector<8x128xf32>
    %219 = vector.extract_strided_slice %218 {offsets = [0, 0], sizes = [8, 32], strides = [1, 1]} : vector<8x128xf32> to vector<8x32xf32>
    %220 = vector.extract_strided_slice %218 {offsets = [0, 32], sizes = [8, 32], strides = [1, 1]} : vector<8x128xf32> to vector<8x32xf32>
    %221 = vector.extract_strided_slice %218 {offsets = [0, 96], sizes = [8, 32], strides = [1, 1]} : vector<8x128xf32> to vector<8x32xf32>
    %222 = vector.extract_strided_slice %213 {offsets = [0, 64], sizes = [8, 32], strides = [1, 1]} : vector<8x128xf32> to vector<8x32xf32>
    %223 = math.tanh %222 : vector<8x32xf32>
    %224 = arith.mulf %220, %185 : vector<8x32xf32>
    %225 = arith.mulf %219, %223 : vector<8x32xf32>
    %226 = arith.addf %224, %225 : vector<8x32xf32>
    %227 = math.tanh %226 : vector<8x32xf32>
    %228 = arith.mulf %221, %227 : vector<8x32xf32>
    %c5_i32 = arith.constant 5 : i32
    %c8_i32_54 = arith.constant 8 : i32
    %229 = arith.muli %c5_i32, %c8_i32_54 : i32
    %230 = tpu.assume_multiple %229, 8 : i32
    %231 = arith.index_cast %230 : i32 to index
    %c0_55 = arith.constant 0 : index
    %232 = vector.load %arg11[%231, %c0_55] : memref<64x128xf32, #tpu.memory_space<vmem>>, vector<8x128xf32>
    %233 = arith.truncf %209 : vector<8x32xf32> to vector<8x32xbf16>
    %cst_56 = arith.constant dense<0.000000e+00> : vector<8x128xf32>
    %234 = tpu.matmul %233, %11, %cst_56 {dimension_numbers = #tpu.dot_dimension_numbers<[1], [0], [0], [1], [0, 0, 1, 1], [], []>} : vector<8x32xbf16>, vector<32x128xbf16>, vector<8x128xf32> -> vector<8x128xf32>
    %235 = arith.addf %232, %234 : vector<8x128xf32>
    %236 = arith.negf %235 : vector<8x128xf32>
    %237 = math.exp %236 : vector<8x128xf32>
    %cst_57 = arith.constant 1.000000e+00 : f32
    %238 = vector.broadcast %cst_57 : f32 to vector<8x128xf32>
    %239 = arith.addf %238, %237 : vector<8x128xf32>
    %240 = arith.divf %238, %239 : vector<8x128xf32>
    %241 = vector.extract_strided_slice %240 {offsets = [0, 0], sizes = [8, 32], strides = [1, 1]} : vector<8x128xf32> to vector<8x32xf32>
    %242 = vector.extract_strided_slice %240 {offsets = [0, 32], sizes = [8, 32], strides = [1, 1]} : vector<8x128xf32> to vector<8x32xf32>
    %243 = vector.extract_strided_slice %240 {offsets = [0, 96], sizes = [8, 32], strides = [1, 1]} : vector<8x128xf32> to vector<8x32xf32>
    %244 = vector.extract_strided_slice %235 {offsets = [0, 64], sizes = [8, 32], strides = [1, 1]} : vector<8x128xf32> to vector<8x32xf32>
    %245 = math.tanh %244 : vector<8x32xf32>
    %246 = arith.mulf %242, %207 : vector<8x32xf32>
    %247 = arith.mulf %241, %245 : vector<8x32xf32>
    %248 = arith.addf %246, %247 : vector<8x32xf32>
    %249 = math.tanh %248 : vector<8x32xf32>
    %250 = arith.mulf %243, %249 : vector<8x32xf32>
    %251 = tpu.concatenate %250, %228 in 1 : vector<8x32xf32>, vector<8x32xf32> -> vector<8x64xf32>
    %252 = arith.truncf %251 : vector<8x64xf32> to vector<8x64xbf16>
    %cst_58 = arith.constant dense<0.000000e+00> : vector<8x128xf32>
    %253 = tpu.matmul %252, %12, %cst_58 {dimension_numbers = #tpu.dot_dimension_numbers<[1], [0], [0], [1], [0, 0, 1, 1], [], []>} : vector<8x64xbf16>, vector<64x128xbf16>, vector<8x128xf32> -> vector<8x128xf32>
    %254 = arith.addf %253, %15 : vector<8x128xf32>
    %255 = arith.negf %254 : vector<8x128xf32>
    %256 = math.exp %255 : vector<8x128xf32>
    %cst_59 = arith.constant 1.000000e+00 : f32
    %257 = vector.broadcast %cst_59 : f32 to vector<8x128xf32>
    %258 = arith.addf %257, %256 : vector<8x128xf32>
    %259 = arith.divf %257, %258 : vector<8x128xf32>
    %260 = vector.extract_strided_slice %259 {offsets = [0, 0], sizes = [8, 32], strides = [1, 1]} : vector<8x128xf32> to vector<8x32xf32>
    %261 = vector.extract_strided_slice %259 {offsets = [0, 32], sizes = [8, 32], strides = [1, 1]} : vector<8x128xf32> to vector<8x32xf32>
    %262 = vector.extract_strided_slice %259 {offsets = [0, 96], sizes = [8, 32], strides = [1, 1]} : vector<8x128xf32> to vector<8x32xf32>
    %263 = vector.extract_strided_slice %254 {offsets = [0, 64], sizes = [8, 32], strides = [1, 1]} : vector<8x128xf32> to vector<8x32xf32>
    %264 = math.tanh %263 : vector<8x32xf32>
    %265 = arith.mulf %261, %226 : vector<8x32xf32>
    %266 = arith.mulf %260, %264 : vector<8x32xf32>
    %267 = arith.addf %265, %266 : vector<8x32xf32>
    %268 = math.tanh %267 : vector<8x32xf32>
    %269 = arith.mulf %262, %268 : vector<8x32xf32>
    %c6_i32 = arith.constant 6 : i32
    %c8_i32_60 = arith.constant 8 : i32
    %270 = arith.muli %c6_i32, %c8_i32_60 : i32
    %271 = tpu.assume_multiple %270, 8 : i32
    %272 = arith.index_cast %271 : i32 to index
    %c0_61 = arith.constant 0 : index
    %273 = vector.load %arg11[%272, %c0_61] : memref<64x128xf32, #tpu.memory_space<vmem>>, vector<8x128xf32>
    %274 = arith.truncf %250 : vector<8x32xf32> to vector<8x32xbf16>
    %cst_62 = arith.constant dense<0.000000e+00> : vector<8x128xf32>
    %275 = tpu.matmul %274, %11, %cst_62 {dimension_numbers = #tpu.dot_dimension_numbers<[1], [0], [0], [1], [0, 0, 1, 1], [], []>} : vector<8x32xbf16>, vector<32x128xbf16>, vector<8x128xf32> -> vector<8x128xf32>
    %276 = arith.addf %273, %275 : vector<8x128xf32>
    %277 = arith.negf %276 : vector<8x128xf32>
    %278 = math.exp %277 : vector<8x128xf32>
    %cst_63 = arith.constant 1.000000e+00 : f32
    %279 = vector.broadcast %cst_63 : f32 to vector<8x128xf32>
    %280 = arith.addf %279, %278 : vector<8x128xf32>
    %281 = arith.divf %279, %280 : vector<8x128xf32>
    %282 = vector.extract_strided_slice %281 {offsets = [0, 0], sizes = [8, 32], strides = [1, 1]} : vector<8x128xf32> to vector<8x32xf32>
    %283 = vector.extract_strided_slice %281 {offsets = [0, 32], sizes = [8, 32], strides = [1, 1]} : vector<8x128xf32> to vector<8x32xf32>
    %284 = vector.extract_strided_slice %281 {offsets = [0, 96], sizes = [8, 32], strides = [1, 1]} : vector<8x128xf32> to vector<8x32xf32>
    %285 = vector.extract_strided_slice %276 {offsets = [0, 64], sizes = [8, 32], strides = [1, 1]} : vector<8x128xf32> to vector<8x32xf32>
    %286 = math.tanh %285 : vector<8x32xf32>
    %287 = arith.mulf %283, %248 : vector<8x32xf32>
    %288 = arith.mulf %282, %286 : vector<8x32xf32>
    %289 = arith.addf %287, %288 : vector<8x32xf32>
    %290 = math.tanh %289 : vector<8x32xf32>
    %291 = arith.mulf %284, %290 : vector<8x32xf32>
    %292 = tpu.concatenate %291, %269 in 1 : vector<8x32xf32>, vector<8x32xf32> -> vector<8x64xf32>
    %293 = arith.truncf %292 : vector<8x64xf32> to vector<8x64xbf16>
    %cst_64 = arith.constant dense<0.000000e+00> : vector<8x128xf32>
    %294 = tpu.matmul %293, %12, %cst_64 {dimension_numbers = #tpu.dot_dimension_numbers<[1], [0], [0], [1], [0, 0, 1, 1], [], []>} : vector<8x64xbf16>, vector<64x128xbf16>, vector<8x128xf32> -> vector<8x128xf32>
    %295 = arith.addf %294, %15 : vector<8x128xf32>
    %296 = arith.negf %295 : vector<8x128xf32>
    %297 = math.exp %296 : vector<8x128xf32>
    %cst_65 = arith.constant 1.000000e+00 : f32
    %298 = vector.broadcast %cst_65 : f32 to vector<8x128xf32>
    %299 = arith.addf %298, %297 : vector<8x128xf32>
    %300 = arith.divf %298, %299 : vector<8x128xf32>
    %301 = vector.extract_strided_slice %300 {offsets = [0, 0], sizes = [8, 32], strides = [1, 1]} : vector<8x128xf32> to vector<8x32xf32>
    %302 = vector.extract_strided_slice %300 {offsets = [0, 32], sizes = [8, 32], strides = [1, 1]} : vector<8x128xf32> to vector<8x32xf32>
    %303 = vector.extract_strided_slice %300 {offsets = [0, 96], sizes = [8, 32], strides = [1, 1]} : vector<8x128xf32> to vector<8x32xf32>
    %304 = vector.extract_strided_slice %295 {offsets = [0, 64], sizes = [8, 32], strides = [1, 1]} : vector<8x128xf32> to vector<8x32xf32>
    %305 = math.tanh %304 : vector<8x32xf32>
    %306 = arith.mulf %302, %267 : vector<8x32xf32>
    %307 = arith.mulf %301, %305 : vector<8x32xf32>
    %308 = arith.addf %306, %307 : vector<8x32xf32>
    %309 = math.tanh %308 : vector<8x32xf32>
    %310 = arith.mulf %303, %309 : vector<8x32xf32>
    %c7_i32 = arith.constant 7 : i32
    %c8_i32_66 = arith.constant 8 : i32
    %311 = arith.muli %c7_i32, %c8_i32_66 : i32
    %312 = tpu.assume_multiple %311, 8 : i32
    %313 = arith.index_cast %312 : i32 to index
    %c0_67 = arith.constant 0 : index
    %314 = vector.load %arg11[%313, %c0_67] : memref<64x128xf32, #tpu.memory_space<vmem>>, vector<8x128xf32>
    %315 = arith.truncf %291 : vector<8x32xf32> to vector<8x32xbf16>
    %cst_68 = arith.constant dense<0.000000e+00> : vector<8x128xf32>
    %316 = tpu.matmul %315, %11, %cst_68 {dimension_numbers = #tpu.dot_dimension_numbers<[1], [0], [0], [1], [0, 0, 1, 1], [], []>} : vector<8x32xbf16>, vector<32x128xbf16>, vector<8x128xf32> -> vector<8x128xf32>
    %317 = arith.addf %314, %316 : vector<8x128xf32>
    %318 = arith.negf %317 : vector<8x128xf32>
    %319 = math.exp %318 : vector<8x128xf32>
    %cst_69 = arith.constant 1.000000e+00 : f32
    %320 = vector.broadcast %cst_69 : f32 to vector<8x128xf32>
    %321 = arith.addf %320, %319 : vector<8x128xf32>
    %322 = arith.divf %320, %321 : vector<8x128xf32>
    %323 = vector.extract_strided_slice %322 {offsets = [0, 0], sizes = [8, 32], strides = [1, 1]} : vector<8x128xf32> to vector<8x32xf32>
    %324 = vector.extract_strided_slice %322 {offsets = [0, 32], sizes = [8, 32], strides = [1, 1]} : vector<8x128xf32> to vector<8x32xf32>
    %325 = vector.extract_strided_slice %322 {offsets = [0, 96], sizes = [8, 32], strides = [1, 1]} : vector<8x128xf32> to vector<8x32xf32>
    %326 = vector.extract_strided_slice %317 {offsets = [0, 64], sizes = [8, 32], strides = [1, 1]} : vector<8x128xf32> to vector<8x32xf32>
    %327 = math.tanh %326 : vector<8x32xf32>
    %328 = arith.mulf %324, %289 : vector<8x32xf32>
    %329 = arith.mulf %323, %327 : vector<8x32xf32>
    %330 = arith.addf %328, %329 : vector<8x32xf32>
    %331 = math.tanh %330 : vector<8x32xf32>
    %332 = arith.mulf %325, %331 : vector<8x32xf32>
    %333 = tpu.concatenate %332, %310 in 1 : vector<8x32xf32>, vector<8x32xf32> -> vector<8x64xf32>
    %334 = arith.truncf %333 : vector<8x64xf32> to vector<8x64xbf16>
    %cst_70 = arith.constant dense<0.000000e+00> : vector<8x128xf32>
    %335 = tpu.matmul %334, %12, %cst_70 {dimension_numbers = #tpu.dot_dimension_numbers<[1], [0], [0], [1], [0, 0, 1, 1], [], []>} : vector<8x64xbf16>, vector<64x128xbf16>, vector<8x128xf32> -> vector<8x128xf32>
    %336 = arith.addf %335, %15 : vector<8x128xf32>
    %337 = arith.negf %336 : vector<8x128xf32>
    %338 = math.exp %337 : vector<8x128xf32>
    %cst_71 = arith.constant 1.000000e+00 : f32
    %339 = vector.broadcast %cst_71 : f32 to vector<8x128xf32>
    %340 = arith.addf %339, %338 : vector<8x128xf32>
    %341 = arith.divf %339, %340 : vector<8x128xf32>
    %342 = vector.extract_strided_slice %341 {offsets = [0, 0], sizes = [8, 32], strides = [1, 1]} : vector<8x128xf32> to vector<8x32xf32>
    %343 = vector.extract_strided_slice %341 {offsets = [0, 32], sizes = [8, 32], strides = [1, 1]} : vector<8x128xf32> to vector<8x32xf32>
    %344 = vector.extract_strided_slice %341 {offsets = [0, 96], sizes = [8, 32], strides = [1, 1]} : vector<8x128xf32> to vector<8x32xf32>
    %345 = vector.extract_strided_slice %336 {offsets = [0, 64], sizes = [8, 32], strides = [1, 1]} : vector<8x128xf32> to vector<8x32xf32>
    %346 = math.tanh %345 : vector<8x32xf32>
    %347 = arith.mulf %343, %308 : vector<8x32xf32>
    %348 = arith.mulf %342, %346 : vector<8x32xf32>
    %349 = arith.addf %347, %348 : vector<8x32xf32>
    %350 = math.tanh %349 : vector<8x32xf32>
    %351 = arith.mulf %344, %350 : vector<8x32xf32>
    %c8_i32_72 = arith.constant 8 : i32
    %c0_73 = arith.constant 0 : index
    %c0_74 = arith.constant 0 : index
    %c0_75 = arith.constant 0 : index
    %352 = vector.load %arg12[%c0_73, %c0_74, %c0_75] : memref<4x8x32xf32, #tpu.memory_space<vmem>>, vector<1x8x32xf32>
    %353 = vector.shape_cast %352 : vector<1x8x32xf32> to vector<8x32xf32>
    %354 = vector.shape_cast %332 : vector<8x32xf32> to vector<1x8x32xf32>
    tpu.vector_store %arg12[%c0_73, %c0_74, %c0_75], %354 {strides = array<i32>} : memref<4x8x32xf32, #tpu.memory_space<vmem>>, vector<1x8x32xf32>,
    %c1_76 = arith.constant 1 : index
    %c0_77 = arith.constant 0 : index
    %c0_78 = arith.constant 0 : index
    %355 = vector.load %arg12[%c1_76, %c0_77, %c0_78] : memref<4x8x32xf32, #tpu.memory_space<vmem>>, vector<1x8x32xf32>
    %356 = vector.shape_cast %355 : vector<1x8x32xf32> to vector<8x32xf32>
    %357 = vector.shape_cast %330 : vector<8x32xf32> to vector<1x8x32xf32>
    tpu.vector_store %arg12[%c1_76, %c0_77, %c0_78], %357 {strides = array<i32>} : memref<4x8x32xf32, #tpu.memory_space<vmem>>, vector<1x8x32xf32>,
    %c2_79 = arith.constant 2 : index
    %c0_80 = arith.constant 0 : index
    %c0_81 = arith.constant 0 : index
    %358 = vector.load %arg12[%c2_79, %c0_80, %c0_81] : memref<4x8x32xf32, #tpu.memory_space<vmem>>, vector<1x8x32xf32>
    %359 = vector.shape_cast %358 : vector<1x8x32xf32> to vector<8x32xf32>
    %360 = vector.shape_cast %351 : vector<8x32xf32> to vector<1x8x32xf32>
    tpu.vector_store %arg12[%c2_79, %c0_80, %c0_81], %360 {strides = array<i32>} : memref<4x8x32xf32, #tpu.memory_space<vmem>>, vector<1x8x32xf32>,
    %c3_82 = arith.constant 3 : index
    %c0_83 = arith.constant 0 : index
    %c0_84 = arith.constant 0 : index
    %361 = vector.load %arg12[%c3_82, %c0_83, %c0_84] : memref<4x8x32xf32, #tpu.memory_space<vmem>>, vector<1x8x32xf32>
    %362 = vector.shape_cast %361 : vector<1x8x32xf32> to vector<8x32xf32>
    %363 = vector.shape_cast %349 : vector<8x32xf32> to vector<1x8x32xf32>
    tpu.vector_store %arg12[%c3_82, %c0_83, %c0_84], %363 {strides = array<i32>} : memref<4x8x32xf32, #tpu.memory_space<vmem>>, vector<1x8x32xf32>,
    %c0_i32_85 = arith.constant 0 : i32
    %364 = arith.cmpi eq, %arg1, %c0_i32_85 : i32
    %365 = arith.extui %364 : i1 to i32
    %c0_i32_86 = arith.constant 0 : i32
    %366 = arith.cmpi ne, %365, %c0_i32_86 : i32
    scf.if %366 {
      %367 = arith.truncf %351 : vector<8x32xf32> to vector<8x32xbf16>
      %c0_87 = arith.constant 0 : index
      %c0_88 = arith.constant 0 : index
      %368 = vector.load %arg8[%c0_87, %c0_88] : memref<32x128xbf16, #tpu.memory_space<vmem>>, vector<32x128xbf16>
      %cst_89 = arith.constant dense<0.000000e+00> : vector<8x128xf32>
      %369 = tpu.matmul %367, %368, %cst_89 {dimension_numbers = #tpu.dot_dimension_numbers<[1], [0], [0], [1], [0, 0, 1, 1], [], []>} : vector<8x32xbf16>, vector<32x128xbf16>, vector<8x128xf32> -> vector<8x128xf32>
      %c0_90 = arith.constant 0 : index
      %c0_91 = arith.constant 0 : index
      %370 = vector.load %arg9[%c0_90, %c0_91] : memref<1x128xf32, #tpu.memory_space<vmem>>, vector<1x128xf32>
      %371 = vector.broadcast %370 : vector<1x128xf32> to vector<8x128xf32>
      %372 = arith.addf %369, %371 : vector<8x128xf32>
      %c0_92 = arith.constant 0 : index
      %c0_93 = arith.constant 0 : index
      %373 = vector.load %arg10[%c0_92, %c0_93] : memref<8x128xf32, #tpu.memory_space<vmem>>, vector<8x128xf32>
      tpu.vector_store %arg10[%c0_92, %c0_93], %372 {strides = array<i32>} : memref<8x128xf32, #tpu.memory_space<vmem>>, vector<8x128xf32>,
    } else {
    }
    return
  }
  func.func @transform_0(%arg0: i32, %arg1: i32) -> (i32, i32, i32) {
    %c0_i32 = arith.constant 0 : i32
    %c0_i32_0 = arith.constant 0 : i32
    return %arg1, %arg0, %c0_i32 : i32, i32, i32
  }
  func.func @transform_1(%arg0: i32, %arg1: i32) -> (i32, i32) {
    %c0_i32 = arith.constant 0 : i32
    %c0_i32_0 = arith.constant 0 : i32
    %c0_i32_1 = arith.constant 0 : i32
    return %c0_i32, %c0_i32_0 : i32, i32
  }
  func.func @transform_2(%arg0: i32, %arg1: i32) -> (i32, i32) {
    %c0_i32 = arith.constant 0 : i32
    %c0_i32_0 = arith.constant 0 : i32
    %c0_i32_1 = arith.constant 0 : i32
    return %c0_i32, %c0_i32_0 : i32, i32
  }
  func.func @transform_3(%arg0: i32, %arg1: i32) -> (i32, i32) {
    %c0_i32 = arith.constant 0 : i32
    %c0_i32_0 = arith.constant 0 : i32
    %c0_i32_1 = arith.constant 0 : i32
    return %c0_i32, %c0_i32_0 : i32, i32
  }
  func.func @transform_4(%arg0: i32, %arg1: i32) -> (i32, i32) {
    %c0_i32 = arith.constant 0 : i32
    %c0_i32_0 = arith.constant 0 : i32
    %c0_i32_1 = arith.constant 0 : i32
    return %c0_i32, %c0_i32_0 : i32, i32
  }
  func.func @transform_5(%arg0: i32, %arg1: i32) -> (i32, i32) {
    %c0_i32 = arith.constant 0 : i32
    %c0_i32_0 = arith.constant 0 : i32
    %c0_i32_1 = arith.constant 0 : i32
    return %c0_i32, %c0_i32_0 : i32, i32
  }
  func.func @transform_6(%arg0: i32, %arg1: i32) -> (i32, i32) {
    %c0_i32 = arith.constant 0 : i32
    %c0_i32_0 = arith.constant 0 : i32
    %c0_i32_1 = arith.constant 0 : i32
    return %c0_i32, %c0_i32_0 : i32, i32
  }
  func.func @transform_7(%arg0: i32, %arg1: i32) -> (i32, i32) {
    %c0_i32 = arith.constant 0 : i32
    %c0_i32_0 = arith.constant 0 : i32
    %c0_i32_1 = arith.constant 0 : i32
    return %c0_i32, %c0_i32_0 : i32, i32
  }
  func.func @transform_8(%arg0: i32, %arg1: i32) -> (i32, i32) {
    %c0_i32 = arith.constant 0 : i32
    %c0_i32_0 = arith.constant 0 : i32
    return %arg0, %c0_i32 : i32, i32
  }
}

</mosaic_0001>

<bundles_post_ra>
// kernel: tpu_custom_call.1
= control target key start
LH: loop header
LB: loop body
LE: loop exit
PB: predicated region body
PF: predicated region fallthrough
CT: control target
= control target key end

     0   :  { %13 = vsyncpa [#allocation5], 0  ;;  %s2697_s0 = inlined_call_operand.hbm [shape: bf16[8,8,16], index: 0, kind: input, shape index: {}]   ;;  %s2698_s1 = inlined_call_operand.hbm [shape: bf16[16,128], index: 1, kind: input, shape index: {}]   ;;  %s2699_s2 = inlined_call_operand.hbm [shape: bf16[32,128], index: 2, kind: input, shape index: {}]   ;;  %s2700_s3 = inlined_call_operand.vmem [shape: f32[1,128], index: 3, kind: input, shape index: {}]   ;;  %s2701_s4 = inlined_call_operand.hbm [shape: bf16[64,128], index: 4, kind: input, shape index: {}]   ;;  %s2702_s5 = inlined_call_operand.vmem [shape: f32[1,128], index: 5, kind: input, shape index: {}]   ;;  %s2703_s6 = inlined_call_operand.vmem [shape: bf16[32,128], index: 6, kind: input, shape index: {}]   ;;  %s2704_s7 = inlined_call_operand.vmem [shape: f32[1,128], index: 7, kind: input, shape index: {}]   ;;  %s2705_s8 = inlined_call_operand.hbm [shape: f32[8,128], index: 8, kind: output, shape index: {}]  }
   0x1   :  { %14 = vsyncpa [#allocation8], 0 }
   0x2   :  { %15 = vsyncpa [#allocation11], 0 }
   0x3   :  { %16 = vsyncpa [#allocation6], 0  ;;  %s2186_s27 = smov [#allocation7]   ;;  %s2187_s29 = smov [#allocation4]  }
   0x4   :  { %s34_s28 = sshll.u32 %s2186_s27, 4  ;;  %s22_s30 = sshll.u32 %s2187_s29, 4  ;;  %s35_s28 = int_to_ptr.vmem [resolvable:$true] %s34_s28  ;;  %s2242_s30 = int_to_ptr.vmem [resolvable:$true] %s22_s30 }
   0x5   :  { %s2068_s11 = scalar_lea.hbm %s2698_s1, 128 }
   0x6   :  { %p2069_p0 = scmp.ne.s32.totalorder %s2698_s1, %s2068_s11  ;;  %p2072_p1 = scmp.lt.u32.totalorder %s2068_s11, %s2698_s1 }
   0x8   :  { %p2074_p2 = pnand %p2072_p1, %p2069_p0 }
   0xa   :  { %2077 = shalt.err (!%p2074_p2)
}
   0xb   :  { %s2078_s16 = scalar_lea.vmem %s35_s28, 128  ;;  %p2083_p4 = scmp.lt.s32.totalorder %s35_s28, %s35_s28 }
   0xc   :  { %p2079_p3 = scmp.ne.s32.totalorder %s35_s28, %s2078_s16  ;;  %p2084_p5 = scmp.lt.s32.totalorder %s2078_s16, %s2078_s16 }
   0xe   :  { %p2085_p6 = por %p2084_p5, %p2083_p4 }
  0x10   :  { %p2086_p7 = pnand %p2085_p6, %p2079_p3 }
  0x12   :  { %2089 = shalt.err (!%p2086_p7)
}
  0x13   :  { %s2188_s17 = smov 64   ;;  %s2189_s18 = smov 4  }
  0x14   :  { %40 = dma.hbm_to_vmem [thread:$0]  %s2698_s1, 128, %s35_s28, [#allocation8], %s2188_s17, %s2188_s17, %s2189_s18  }
  0x15   :  { %s2090_s23 = scalar_lea.hbm %s2697_s0, 512 }
  0x16   :  { %p2091_p8 = scmp.ne.s32.totalorder %s2697_s0, %s2090_s23  ;;  %p2094_p9 = scmp.lt.u32.totalorder %s2090_s23, %s2697_s0 }
  0x18   :  { %p2096_p10 = pnand %p2094_p9, %p2091_p8 }
  0x1a   :  { %2099 = shalt.err (!%p2096_p10)
}
  0x1b   :  { %s2100_s29 = scalar_lea.vmem %s2242_s30, 512  ;;  %p2105_p12 = scmp.lt.s32.totalorder %s2242_s30, %s2242_s30 }
  0x1c   :  { %p2101_p11 = scmp.ne.s32.totalorder %s2242_s30, %s2100_s29  ;;  %p2106_p13 = scmp.lt.s32.totalorder %s2100_s29, %s2100_s29 }
  0x1e   :  { %p2107_p0 = por %p2106_p13, %p2105_p12 }
  0x20   :  { %p2108_p1 = pnand %p2107_p0, %p2101_p11 }
  0x22   :  { %2111 = shalt.err (!%p2108_p1)
}
  0x23   :  { %28 = dma.hbm_to_vmem [thread:$0]  %s2697_s0, 512, %s2242_s30, [#allocation5], %s2188_s17, %s2188_s17, %s2189_s18  }
  0x24   :  { %s2190_s9 = smov [#allocation9]   ;;  %s2191_s11 = smov [#allocation10]  }
  0x25   :  { %s46_s10 = sshll.u32 %s2190_s9, 4  ;;  %s60_s12 = sshll.u32 %s2191_s11, 4  ;;  %s47_s10 = int_to_ptr.vmem [resolvable:$true] %s46_s10  ;;  %s2279_s12 = int_to_ptr.vmem [resolvable:$true] %s60_s12 }
  0x26   :  { %s2112_s15 = scalar_lea.hbm %s2699_s2, 256 }
  0x27   :  { %p2113_p2 = scmp.ne.s32.totalorder %s2699_s2, %s2112_s15  ;;  %p2116_p3 = scmp.lt.u32.totalorder %s2112_s15, %s2699_s2 }
  0x29   :  { %p2118_p4 = pnand %p2116_p3, %p2113_p2 }
  0x2b   :  { %2121 = shalt.err (!%p2118_p4)
}
  0x2c   :  { %s2122_s0 = scalar_lea.vmem %s47_s10, 256  ;;  %p2127_p6 = scmp.lt.s32.totalorder %s47_s10, %s47_s10 }
  0x2d   :  { %p2123_p5 = scmp.ne.s32.totalorder %s47_s10, %s2122_s0  ;;  %p2128_p7 = scmp.lt.s32.totalorder %s2122_s0, %s2122_s0 }
  0x2f   :  { %p2129_p8 = por %p2128_p7, %p2127_p6 }
  0x31   :  { %p2130_p9 = pnand %p2129_p8, %p2123_p5 }
  0x33   :  { %2133 = shalt.err (!%p2130_p9)
}
  0x34   :  { %52 = dma.hbm_to_vmem [thread:$0]  %s2699_s2, 256, %s47_s10, [#allocation8], %s2188_s17, %s2188_s17, %s2189_s18  }
  0x35   :  { %s2134_s25 = scalar_lea.hbm %s2701_s4, 512 }
  0x36   :  { %p2135_p10 = scmp.ne.s32.totalorder %s2701_s4, %s2134_s25  ;;  %p2138_p11 = scmp.lt.u32.totalorder %s2134_s25, %s2701_s4 }
  0x38   :  { %p2140_p12 = pnand %p2138_p11, %p2135_p10 }
  0x3a   :  { %2143 = shalt.err (!%p2140_p12)
}
  0x3b   :  { %s2144_s28 = scalar_lea.vmem %s2279_s12, 512  ;;  %p2149_p0 = scmp.lt.s32.totalorder %s2279_s12, %s2279_s12 }
  0x3c   :  { %p2145_p13 = scmp.ne.s32.totalorder %s2279_s12, %s2144_s28  ;;  %p2150_p1 = scmp.lt.s32.totalorder %s2144_s28, %s2144_s28 }
  0x3e   :  { %p2151_p2 = por %p2150_p1, %p2149_p0 }
  0x40   :  { %p2152_p3 = pnand %p2151_p2, %p2145_p13 }
  0x42   :  { %2155 = shalt.err (!%p2152_p3)
}
  0x43   :  { %66 = dma.hbm_to_vmem [thread:$0]  %s2701_s4, 512, %s2279_s12, [#allocation11], %s2188_s17, %s2188_s17, %s2189_s18  }
  0x44   :  { %2178 = dma.done.wait [#allocation5], 512  }
  0x45   :  { %2179 = vsyncadd [#allocation5], 4294966784 }
  0x46   :  { %2180 = dma.done.wait [#allocation8], 384  }
  0x47   :  { %2181 = vsyncadd [#allocation8], 4294966912 }
  0x48   :  { %2182 = dma.done.wait [#allocation11], 512  }
  0x49   :  { %2183 = vsyncadd [#allocation11], 4294966784  ;;  %vm90_vm0 = vcmask 261120   ;;  %v2192_v0 = vmov 0.0   ;;  %vm2193_vm1 = vmmov 0   ;;  %v1926_v1 = vld [vmem:[#allocation7] sm:$0xff]  }
  0x4a   :  { %1742 = vmatprep.subr.bf16.mxu1 %v2192_v0  ;;  %1746 = vmatprep.mubr.msk.bf16.mxu1 %vm2193_vm1, %v2192_v0  ;;  %91 = vst.msk [vmem:[#allocation3] sm:$0xff] %vm90_vm0, %v2192_v0  ;;  %92 = vst.msk [vmem:[#allocation3 + $0x8] sm:$0xff] %vm90_vm0, %v2192_v0  ;;  %v2327_v2 = vld [vmem:[#allocation9] sm:$0xff]   ;;  %vm138_vm2 = vcmask 130048   ;;  %v1928_v3 = vld [vmem:[#allocation4] sm:$0xff]   ;;  %s2194_s10 = smov 32  }
  0x4b   :  { %93 = vst.msk [vmem:[#allocation3 + $0x10] sm:$0xff] %vm90_vm0, %v2192_v0  ;;  %94 = vst.msk [vmem:[#allocation3 + $0x18] sm:$0xff] %vm90_vm0, %v2192_v0  ;;  %1732 = vmatprep.subr.bf16.mxu0 %v1926_v1  ;;  %1743 = vmatpush3.bf16.msra.mxu1 %v2327_v2  ;;  %v1929_v4 = vld [vmem:[#allocation4 + $0x8] sm:$0xff]   ;;  %v2332_v5 = vld [vmem:[#allocation9 + $0x8] sm:$0xff]   ;;  %vm371_vm3 = vcmask 523264   ;;  %s2195_s19 = smov 96  }
  0x4c   :  { %1733 = vmatpush3.bf16.msra.mxu0 %v1926_v1  ;;  %1734 = vmatprep.mubr.msk.bf16.mxu0 %vm138_vm2, %v1928_v3  ;;  %v2348_v8 = vld [vmem:[%s2700_s3] ss:$0 sm:$0xff]  ;;  %v2363_v31 = vld [vmem:[#allocation10] sm:$0xff]   ;;  %v1932_v32 = vld [vmem:[#allocation4 + $0x10] sm:$0xff]   ;;  %s2196_s20 = smov [#allocation12]  }
  0x4d   :  { %1744 = vmatprep.subr.bf16.mxu1 %v2192_v0  ;;  %1750 = vmatprep.subr.bf16.mxu0 %v2192_v0  ;;  %v1934_v33 = vld [vmem:[#allocation4 + $0x18] sm:$0xff]   ;;  %v2367_v34 = vld [vmem:[#allocation10 + $0x8] sm:$0xff]   ;;  %v2374_v35 = vld [vmem:[#allocation10 + $0x10] sm:$0xff]   ;;  %s1596_s21 = sshll.u32 %s2196_s20, 4  ;;  %s1597_s21 = int_to_ptr.vmem [resolvable:$true] %s1596_s21 }
  0x4e   :  { %v2380_v37 = vld [vmem:[#allocation10 + $0x18] sm:$0xff]   ;;  %v2418_v59 = vld [vmem:[%s2702_s5] ss:$0 sm:$0xff]  ;;  %s2156_s0 = scalar_lea.vmem %s1597_s21, 128  ;;  %p2161_p5 = scmp.lt.s32.totalorder %s1597_s21, %s1597_s21 }
  0x4f   :  { %1735 = vmatmul.mubr.msk.bf16.vlgmr.msra.gmra.mrb[0].mxu0 %vm138_vm2, %v1929_v4  ;;  %1745 = vmatpush3.bf16.msra.mxu1 %v2332_v5  ;;  %p2157_p4 = scmp.ne.s32.totalorder %s1597_s21, %s2156_s0  ;;  %p2162_p6 = scmp.lt.s32.totalorder %s2156_s0, %s2156_s0 }
  0x50   :  { %1762 = vmatprep.subr.bf16.mxu1 %v2192_v0  ;;  %1751 = vmatpush3.bf16.msra.mxu0 %v2363_v31 }
  0x51   :  { %v243_v6 = vld [vmem:[#allocation3] sm:$0xff]  ;;  %v245_v20 = vld [vmem:[#allocation3 + $0x8] sm:$0xff]  ;;  %1738 = vmatprep.mubr.msk.bf16.mxu0 %vm138_vm2, %v1932_v32  ;;  %1752 = vmatprep.subr.bf16.mxu0 %v2192_v0  ;;  %p2163_p7 = por %p2162_p6, %p2161_p5 }
  0x52   :  { %v251_v7 = vpack.c.bf16 %v243_v6, %v243_v6  ;;  %v247_v38 = vld [vmem:[#allocation3 + $0x10] sm:$0xff]  ;;  %v249_v6 = vld [vmem:[#allocation3 + $0x18] sm:$0xff] }
  0x53   :  { %p2164_p8 = pnand %p2163_p7, %p2157_p4 }
  0x54   :  { %1747 = vmatmul.mubr.msk.bf16.vlgmr.msra.gmra.mrb[0].mxu1 %vm90_vm0, %v251_v7  ;;  %1753 = vmatpush3.bf16.msra.mxu0 %v2367_v34 }
  0x55   :  { %1763 = vmatpush3.bf16.msra.mxu1 %v2327_v2  ;;  %1766 = vmatprep.mubr.msk.bf16.mxu1 %vm2193_vm1, %v2192_v0 }
  0x56   :  { %1764 = vmatprep.subr.bf16.mxu1 %v2192_v0  ;;  %1754 = vmatprep.subr.bf16.mxu0 %v2192_v0 }
  0x57   :  { %1739 = vmatmul.mubr.msk.bf16.gmra.mrb[4].mxu0 %vm138_vm2, %v1934_v33 }
  0x58   :  { %1758 = vmatprep.mubr.msk.bf16.mxu0 %vm2193_vm1, %v2192_v0  ;;  %1755 = vmatpush3.bf16.msra.mxu0 %v2374_v35 }
  0x59   :  { %1765 = vmatpush3.bf16.msra.mxu1 %v2332_v5  ;;  %1756 = vmatprep.subr.bf16.mxu0 %v2192_v0 }
  0x5a   :  { %1770 = vmatprep.subr.bf16.mxu1 %v2192_v0 }
  0x5c   :  { %1757 = vmatpush3.bf16.msra.mxu0 %v2380_v37 }
  0x5d   :  { %1782 = vmatprep.subr.bf16.mxu0 %v2192_v0 }
 0x122   :  { %v2350_v9 = vpop.f32.mrb[0].mxu0 }
 0x123   :  { %v185_v10 = vpop.f32.mrb[1].mxu0 }
 0x124   :  { %v186_v11 = vadd.f32 %v2348_v8, %v185_v10  ;;  %v2353_v12 = vpop.f32.mrb[2].mxu0 }
 0x125   :  { %v2355_v13 = vpop.f32.mrb[3].mxu0 }
 0x126   :  { %v189_v53 = vadd.f32 %v2348_v8, %v2355_v13 }
 0x127   :  { %v302_v14 = vpop.f32.mrb[0].mxu1 }
 0x128   :  { %v308_v15 = vadd.f32 %v302_v14, %v186_v11  ;;  %v1748_v16 = vpop.f32.mrb[1].mxu1 }
 0x129   :  { %v305_v17 = vpop.f32.mrb[2].mxu1 }
 0x12a   :  { %v1749_v18 = vpop.f32.mrb[3].mxu1  ;;  %1939 = vtanh.f32 %v308_v15  ;;  %v1621_v21 = vmul.f32 -1.442695, %v308_v15  ;;  %v2386_v43 = vpop.f32.mrb[4].mxu0 }
 0x12b   :  { %v2388_v44 = vpop.f32.mrb[5].mxu0 }
 0x12c   :  { %1941 = vpow2.f32 %v1621_v21  ;;  %v2390_v45 = vpop.f32.mrb[6].mxu0 }
 0x12d   :  { %v2392_v46 = vpop.f32.mrb[7].mxu0 }
 0x134   :  { %v1940_v19 = vpop.eup %1939 }
 0x135   :  { %322 = vrot.lane.b32.xlu0 %v1940_v19, %s2188_s17 }
 0x136   :  { %v1942_v22 = vpop.eup %1941 }
 0x137   :  { %v312_v23 = vadd.f32 1.0, %v1942_v22 }
 0x139   :  { %317 = vrot.lane.b32.xlu0 %v245_v20, %s2194_s10  ;;  %1943 = vrcp.f32 %v312_v23 }
 0x143   :  { %v1944_v24 = vpop.eup %1943 }
 0x1a7   :  { %v323_v25 = vpop.permute.xlu0 %322 }
 0x1a8   :  { %v325_v26 = vmul.f32 %v1944_v24, %v323_v25 }
 0x1aa   :  { %327 = vrot.lane.b32.xlu1 %v325_v26, %s2194_s10 }
 0x1ab   :  { %v318_v27 = vpop.permute.xlu0 %317 }
 0x1ac   :  { %v320_v28 = vmul.f32 %v1944_v24, %v318_v27 }
 0x21c   :  { %v328_v29 = vpop.permute.xlu1 %327 }
 0x21d   :  { %v2360_v30 = vadd.f32 %v328_v29, %v320_v28 }
 0x21f   :  { %1945 = vtanh.f32 %v2360_v30 }
 0x229   :  { %v1946_v36 = vpop.eup %1945 }
 0x22a   :  { %333 = vrot.lane.b32.xlu1 %v1946_v36, %s2188_s17 }
 0x29c   :  { %v334_v39 = vpop.permute.xlu1 %333 }
 0x29d   :  { %v336_v40 = vmul.f32 %v1944_v24, %v334_v39 }
 0x29f   :  { %v1921_v41 = vpack.i.bf16 %v247_v38, %v336_v40  ;;  %v445_v42 = vpack.c.bf16 %v336_v40, %v336_v40 }
 0x2a1   :  { %1922 = vrot.lane.b32.xlu0 %v1921_v41, %s2194_s10  ;;  %447 = vrot.lane.b32.xlu1 %v445_v42, %s2194_s10 }
 0x313   :  { %v1923_v47 = vpop.permute.xlu0 %1922  ;;  %v448_v48 = vpop.permute.xlu1 %447 }
 0x314   :  { %v1925_v49 = vunpack.i.h.bf16 %v1923_v47  ;;  %v1924_v50 = vunpack.i.l.bf16 %v1923_v47  ;;  %1767 = vmatmul.mubr.msk.bf16.vlgmr.msra.gmra.mrb[4].mxu1 %vm90_vm0, %v448_v48 }
 0x315   :  { %1771 = vmatpush3.bf16.msra.mxu1 %v2363_v31  ;;  %1778 = vmatprep.mubr.msk.bf16.mxu1 %vm2193_vm1, %v2192_v0 }
 0x316   :  { %v345_v51 = vsel %vm90_vm0, %v1924_v50, %v1925_v49  ;;  %1772 = vmatprep.subr.bf16.mxu1 %v2192_v0  ;;  %v194_v49 = vadd.f32 %v2350_v9, %v2348_v8 }
 0x317   :  { %v346_v52 = vpack.c.bf16 %v345_v51, %v345_v51 }
 0x319   :  { %1759 = vmatmul.mubr.msk.bf16.vlgmr.msra.gmra.mrb[8].mxu0 %vm371_vm3, %v346_v52  ;;  %1773 = vmatpush3.bf16.msra.mxu1 %v2367_v34 }
 0x31a   :  { %1783 = vmatpush3.bf16.msra.mxu0 %v2327_v2  ;;  %1774 = vmatprep.subr.bf16.mxu1 %v2192_v0 }
 0x31b   :  { %1784 = vmatprep.subr.bf16.mxu0 %v2192_v0  ;;  %1786 = vmatprep.mubr.msk.bf16.mxu0 %vm2193_vm1, %v2192_v0 }
 0x31d   :  { %1775 = vmatpush3.bf16.msra.mxu1 %v2374_v35 }
 0x31e   :  { %1785 = vmatpush3.bf16.msra.mxu0 %v2332_v5  ;;  %1776 = vmatprep.subr.bf16.mxu1 %v2192_v0 }
 0x31f   :  { %1790 = vmatprep.subr.bf16.mxu0 %v2192_v0 }
 0x321   :  { %1777 = vmatpush3.bf16.msra.mxu1 %v2380_v37 }
 0x322   :  { %1802 = vmatprep.subr.bf16.mxu1 %v2192_v0 }
 0x3e7   :  { %v486_v54 = vpop.f32.mrb[4].mxu1 }
 0x3e8   :  { %v492_v55 = vadd.f32 %v486_v54, %v189_v53  ;;  %v1768_v56 = vpop.f32.mrb[5].mxu1 }
 0x3e9   :  { %v489_v57 = vpop.f32.mrb[6].mxu1 }
 0x3ea   :  { %1947 = vtanh.f32 %v492_v55  ;;  %v1769_v58 = vpop.f32.mrb[7].mxu1  ;;  %v1629_v7 = vmul.f32 -1.442695, %v492_v55 }
 0x3ec   :  { %v409_v60 = vpop.f32.mrb[8].mxu0 }
 0x3ed   :  { %v410_v61 = vadd.f32 %v2418_v59, %v409_v60  ;;  %v1760_v62 = vpop.f32.mrb[9].mxu0 }
 0x3ee   :  { %v412_v63 = vpop.f32.mrb[10].mxu0 }
 0x3ef   :  { %1949 = vtanh.f32 %v410_v61  ;;  %v1761_v1 = vpop.f32.mrb[11].mxu0  ;;  %v1627_v10 = vmul.f32 -1.442695, %v410_v61 }
 0x3f0   :  { %1951 = vpow2.f32 %v1629_v7 }
 0x3f1   :  { %1953 = vpow2.f32 %v1627_v10 }
 0x3f4   :  { %v1948_v3 = vpop.eup %1947 }
 0x3f5   :  { %502 = vrot.lane.b32.xlu1 %v1948_v3, %s2188_s17 }
 0x3f9   :  { %v1950_v4 = vpop.eup %1949 }
 0x3fa   :  { %428 = vrot.lane.b32.xlu0 %v1950_v4, %s2188_s17  ;;  %v1952_v11 = vpop.eup %1951 }
 0x3fb   :  { %v496_v13 = vadd.f32 1.0, %v1952_v11  ;;  %v1954_v14 = vpop.eup %1953 }
 0x3fc   :  { %v418_v15 = vadd.f32 1.0, %v1954_v14 }
 0x3fd   :  { %1955 = vrcp.f32 %v496_v13 }
 0x3fe   :  { %423 = vrot.lane.b32.xlu0 %v249_v6, %s2194_s10  ;;  %1957 = vrcp.f32 %v418_v15 }
 0x407   :  { %v1956_v16 = vpop.eup %1955 }
 0x408   :  { %v1958_v19 = vpop.eup %1957  ;;  %v500_v23 = vmul.f32 %v1956_v16, %v2360_v30 }
 0x467   :  { %v503_v17 = vpop.permute.xlu1 %502 }
 0x468   :  { %v505_v18 = vmul.f32 %v1956_v16, %v503_v17 }
 0x46a   :  { %507 = vrot.lane.b32.xlu0 %v505_v18, %s2194_s10 }
 0x46c   :  { %v429_v20 = vpop.permute.xlu0 %428 }
 0x46d   :  { %v431_v21 = vmul.f32 %v1958_v19, %v429_v20 }
 0x46f   :  { %433 = vrot.lane.b32.xlu1 %v431_v21, %s2194_s10 }
 0x470   :  { %v424_v22 = vpop.permute.xlu0 %423 }
 0x471   :  { %v426_v26 = vmul.f32 %v1958_v19, %v424_v22 }
 0x4dc   :  { %v508_v24 = vpop.permute.xlu0 %507 }
 0x4dd   :  { %v2427_v25 = vadd.f32 %v508_v24, %v500_v23 }
 0x4df   :  { %1959 = vtanh.f32 %v2427_v25 }
 0x4e1   :  { %v434_v27 = vpop.permute.xlu1 %433 }
 0x4e2   :  { %v2430_v28 = vadd.f32 %v434_v27, %v426_v26 }
 0x4e4   :  { %1961 = vtanh.f32 %v2430_v28 }
 0x4e9   :  { %v1960_v29 = vpop.eup %1959 }
 0x4ea   :  { %513 = vrot.lane.b32.xlu0 %v1960_v29, %s2188_s17 }
 0x4ee   :  { %v1962_v32 = vpop.eup %1961 }
 0x4ef   :  { %439 = vrot.lane.b32.xlu1 %v1962_v32, %s2188_s17 }
 0x55c   :  { %v514_v33 = vpop.permute.xlu0 %513 }
 0x55d   :  { %v516_v36 = vmul.f32 %v1956_v16, %v514_v33 }
 0x55f   :  { %518 = vrot.lane.b32.xlu1 %v516_v36, %s2194_s10  ;;  %v596_v30 = vpack.c.bf16 %v516_v36, %v516_v36 }
 0x561   :  { %v440_v38 = vpop.permute.xlu1 %439 }
 0x562   :  { %v442_v39 = vmul.f32 %v1958_v19, %v440_v38  ;;  %v197_v38 = vadd.f32 %v2353_v12, %v2348_v8 }
 0x563   :  { %598 = vrot.lane.b32.xlu1 %v596_v30, %s2194_s10 }
 0x564   :  { %522 = vrot.lane.b32.xlu0 %v442_v39, %s2188_s17 }
 0x5d1   :  { %v519_v40 = vpop.permute.xlu1 %518 }
 0x5d5   :  { %v599_v41 = vpop.permute.xlu1 %598 }
 0x5d6   :  { %1787 = vmatmul.mubr.msk.bf16.vlgmr.msra.gmra.mrb[12].mxu0 %vm90_vm0, %v599_v41  ;;  %v523_v42 = vpop.permute.xlu0 %522 }
 0x5d7   :  { %v525_v47 = vsel %vm90_vm0, %v519_v40, %v523_v42  ;;  %1791 = vmatpush3.bf16.msra.mxu0 %v2363_v31  ;;  %1798 = vmatprep.mubr.msk.bf16.mxu0 %vm2193_vm1, %v2192_v0 }
 0x5d8   :  { %v526_v48 = vpack.c.bf16 %v525_v47, %v525_v47  ;;  %1792 = vmatprep.subr.bf16.mxu0 %v2192_v0 }
 0x5da   :  { %1779 = vmatmul.mubr.msk.bf16.vlgmr.msra.gmra.mrb[8].mxu1 %vm371_vm3, %v526_v48 }
 0x5db   :  { %1793 = vmatpush3.bf16.msra.mxu0 %v2367_v34  ;;  %1803 = vmatpush3.bf16.msra.mxu1 %v2327_v2 }
 0x5dc   :  { %1794 = vmatprep.subr.bf16.mxu0 %v2192_v0  ;;  %1804 = vmatprep.subr.bf16.mxu1 %v2192_v0 }
 0x5dd   :  { %1806 = vmatprep.mubr.msk.bf16.mxu1 %vm2193_vm1, %v2192_v0 }
 0x5df   :  { %1795 = vmatpush3.bf16.msra.mxu0 %v2374_v35  ;;  %1805 = vmatpush3.bf16.msra.mxu1 %v2332_v5 }
 0x5e0   :  { %1796 = vmatprep.subr.bf16.mxu0 %v2192_v0  ;;  %1810 = vmatprep.subr.bf16.mxu1 %v2192_v0 }
 0x5e3   :  { %1797 = vmatpush3.bf16.msra.mxu0 %v2380_v37 }
 0x5e4   :  { %1822 = vmatprep.subr.bf16.mxu0 %v2192_v0 }
 0x6a9   :  { %v637_v50 = vpop.f32.mrb[12].mxu0 }
 0x6aa   :  { %v643_v51 = vadd.f32 %v637_v50, %v194_v49  ;;  %v1788_v52 = vpop.f32.mrb[13].mxu0 }
 0x6ab   :  { %v640_v53 = vpop.f32.mrb[14].mxu0 }
 0x6ac   :  { %1963 = vtanh.f32 %v643_v51  ;;  %v1789_v54 = vpop.f32.mrb[15].mxu0  ;;  %v1633_v9 = vmul.f32 -1.442695, %v643_v51 }
 0x6ad   :  { %v564_v55 = vpop.f32.mrb[8].mxu1 }
 0x6ae   :  { %v565_v56 = vadd.f32 %v2418_v59, %v564_v55  ;;  %v1780_v57 = vpop.f32.mrb[9].mxu1 }
 0x6af   :  { %v567_v58 = vpop.f32.mrb[10].mxu1 }
 0x6b0   :  { %1965 = vtanh.f32 %v565_v56  ;;  %v1781_v60 = vpop.f32.mrb[11].mxu1  ;;  %v1631_v63 = vmul.f32 -1.442695, %v565_v56 }
 0x6b1   :  { %1967 = vpow2.f32 %v1633_v9 }
 0x6b2   :  { %1969 = vpow2.f32 %v1631_v63 }
 0x6b6   :  { %v1964_v61 = vpop.eup %1963 }
 0x6b7   :  { %653 = vrot.lane.b32.xlu1 %v1964_v61, %s2188_s17 }
 0x6ba   :  { %v1966_v62 = vpop.eup %1965 }
 0x6bb   :  { %579 = vrot.lane.b32.xlu0 %v1966_v62, %s2188_s17  ;;  %v1968_v1 = vpop.eup %1967 }
 0x6bc   :  { %v647_v3 = vadd.f32 1.0, %v1968_v1  ;;  %v1970_v4 = vpop.eup %1969 }
 0x6bd   :  { %v573_v6 = vadd.f32 1.0, %v1970_v4 }
 0x6be   :  { %1971 = vrcp.f32 %v647_v3 }
 0x6bf   :  { %1973 = vrcp.f32 %v573_v6 }
 0x6c8   :  { %v1972_v7 = vpop.eup %1971 }
 0x6c9   :  { %v1974_v13 = vpop.eup %1973  ;;  %v651_v16 = vmul.f32 %v1972_v7, %v2427_v25 }
 0x6ca   :  { %v577_v19 = vmul.f32 %v1974_v13, %v2430_v28 }
 0x729   :  { %v654_v10 = vpop.permute.xlu1 %653 }
 0x72a   :  { %v656_v11 = vmul.f32 %v1972_v7, %v654_v10 }
 0x72c   :  { %658 = vrot.lane.b32.xlu1 %v656_v11, %s2194_s10 }
 0x72d   :  { %v580_v14 = vpop.permute.xlu0 %579 }
 0x72e   :  { %v582_v15 = vmul.f32 %v1974_v13, %v580_v14 }
 0x730   :  { %584 = vrot.lane.b32.xlu0 %v582_v15, %s2194_s10 }
 0x79e   :  { %v659_v17 = vpop.permute.xlu1 %658 }
 0x79f   :  { %v2465_v18 = vadd.f32 %v659_v17, %v651_v16 }
 0x7a1   :  { %1975 = vtanh.f32 %v2465_v18 }
 0x7a2   :  { %v585_v20 = vpop.permute.xlu0 %584 }
 0x7a3   :  { %v2469_v21 = vadd.f32 %v585_v20, %v577_v19 }
 0x7a5   :  { %1977 = vtanh.f32 %v2469_v21 }
 0x7ab   :  { %v1976_v22 = vpop.eup %1975 }
 0x7ac   :  { %664 = vrot.lane.b32.xlu1 %v1976_v22, %s2188_s17 }
 0x7af   :  { %v1978_v23 = vpop.eup %1977 }
 0x7b0   :  { %590 = vrot.lane.b32.xlu0 %v1978_v23, %s2188_s17 }
 0x81e   :  { %v665_v24 = vpop.permute.xlu1 %664 }
 0x81f   :  { %v667_v25 = vmul.f32 %v1972_v7, %v665_v24 }
 0x821   :  { %669 = vrot.lane.b32.xlu0 %v667_v25, %s2194_s10  ;;  %v747_v27 = vpack.c.bf16 %v667_v25, %v667_v25 }
 0x822   :  { %v591_v26 = vpop.permute.xlu0 %590 }
 0x823   :  { %v593_v29 = vmul.f32 %v1974_v13, %v591_v26  ;;  %v202_v26 = vadd.f32 %v2348_v8, %v2388_v44 }
 0x825   :  { %749 = vrot.lane.b32.xlu0 %v747_v27, %s2194_s10  ;;  %673 = vrot.lane.b32.xlu1 %v593_v29, %s2188_s17 }
 0x893   :  { %v670_v28 = vpop.permute.xlu0 %669 }
 0x897   :  { %v674_v32 = vpop.permute.xlu1 %673  ;;  %v750_v33 = vpop.permute.xlu0 %749 }
 0x898   :  { %v676_v36 = vsel %vm90_vm0, %v670_v28, %v674_v32  ;;  %1807 = vmatmul.mubr.msk.bf16.vlgmr.msra.gmra.mrb[12].mxu1 %vm90_vm0, %v750_v33 }
 0x899   :  { %v677_v30 = vpack.c.bf16 %v676_v36, %v676_v36  ;;  %1811 = vmatpush3.bf16.msra.mxu1 %v2363_v31  ;;  %1818 = vmatprep.mubr.msk.bf16.mxu1 %vm2193_vm1, %v2192_v0 }
 0x89a   :  { %1812 = vmatprep.subr.bf16.mxu1 %v2192_v0 }
 0x89b   :  { %1799 = vmatmul.mubr.msk.bf16.vlgmr.msra.gmra.mrb[16].mxu0 %vm371_vm3, %v677_v30 }
 0x89c   :  { %1823 = vmatpush3.bf16.msra.mxu0 %v2327_v2  ;;  %1826 = vmatprep.mubr.msk.bf16.mxu0 %vm2193_vm1, %v2192_v0 }
 0x89d   :  { %1813 = vmatpush3.bf16.msra.mxu1 %v2367_v34  ;;  %1824 = vmatprep.subr.bf16.mxu0 %v2192_v0 }
 0x89e   :  { %1814 = vmatprep.subr.bf16.mxu1 %v2192_v0 }
 0x8a0   :  { %1825 = vmatpush3.bf16.msra.mxu0 %v2332_v5 }
 0x8a1   :  { %1815 = vmatpush3.bf16.msra.mxu1 %v2374_v35  ;;  %1830 = vmatprep.subr.bf16.mxu0 %v2192_v0 }
 0x8a2   :  { %1816 = vmatprep.subr.bf16.mxu1 %v2192_v0 }
 0x8a5   :  { %1817 = vmatpush3.bf16.msra.mxu1 %v2380_v37 }
 0x8a6   :  { %1842 = vmatprep.subr.bf16.mxu1 %v2192_v0 }
 0x96b   :  { %v788_v39 = vpop.f32.mrb[12].mxu1 }
 0x96c   :  { %v794_v40 = vadd.f32 %v788_v39, %v197_v38  ;;  %v1808_v41 = vpop.f32.mrb[13].mxu1 }
 0x96d   :  { %v791_v42 = vpop.f32.mrb[14].mxu1 }
 0x96e   :  { %1979 = vtanh.f32 %v794_v40  ;;  %v715_v47 = vpop.f32.mrb[16].mxu0  ;;  %v1809_v48 = vpop.f32.mrb[15].mxu1  ;;  %v1637_v12 = vmul.f32 -1.442695, %v794_v40 }
 0x96f   :  { %v716_v49 = vadd.f32 %v2418_v59, %v715_v47  ;;  %v1800_v50 = vpop.f32.mrb[17].mxu0 }
 0x970   :  { %v718_v51 = vpop.f32.mrb[18].mxu0 }
 0x971   :  { %1981 = vtanh.f32 %v716_v49  ;;  %v1801_v52 = vpop.f32.mrb[19].mxu0  ;;  %v1635_v55 = vmul.f32 -1.442695, %v716_v49 }
 0x972   :  { %1983 = vpow2.f32 %v1637_v12 }
 0x973   :  { %1985 = vpow2.f32 %v1635_v55 }
 0x978   :  { %v1980_v53 = vpop.eup %1979 }
 0x979   :  { %804 = vrot.lane.b32.xlu0 %v1980_v53, %s2188_s17 }
 0x97b   :  { %v1982_v54 = vpop.eup %1981 }
 0x97c   :  { %730 = vrot.lane.b32.xlu1 %v1982_v54, %s2188_s17  ;;  %v1984_v56 = vpop.eup %1983 }
 0x97d   :  { %v1986_v57 = vpop.eup %1985  ;;  %v798_v58 = vadd.f32 1.0, %v1984_v56 }
 0x97e   :  { %v724_v60 = vadd.f32 1.0, %v1986_v57 }
 0x97f   :  { %1987 = vrcp.f32 %v798_v58 }
 0x980   :  { %1989 = vrcp.f32 %v724_v60 }
 0x989   :  { %v1988_v61 = vpop.eup %1987 }
 0x98a   :  { %v1990_v63 = vpop.eup %1989  ;;  %v802_v4 = vmul.f32 %v1988_v61, %v2465_v18 }
 0x98b   :  { %v728_v10 = vmul.f32 %v1990_v63, %v2469_v21 }
 0x9eb   :  { %v805_v62 = vpop.permute.xlu0 %804 }
 0x9ec   :  { %v807_v9 = vmul.f32 %v1988_v61, %v805_v62 }
 0x9ee   :  { %v731_v1 = vpop.permute.xlu1 %730  ;;  %809 = vrot.lane.b32.xlu0 %v807_v9, %s2194_s10 }
 0x9ef   :  { %v733_v3 = vmul.f32 %v1990_v63, %v731_v1 }
 0x9f1   :  { %735 = vrot.lane.b32.xlu1 %v733_v3, %s2194_s10 }
 0xa60   :  { %v810_v6 = vpop.permute.xlu0 %809 }
 0xa61   :  { %v2504_v7 = vadd.f32 %v810_v6, %v802_v4 }
 0xa63   :  { %1991 = vtanh.f32 %v2504_v7  ;;  %v736_v11 = vpop.permute.xlu1 %735 }
 0xa64   :  { %v2508_v13 = vadd.f32 %v736_v11, %v728_v10 }
 0xa66   :  { %1993 = vtanh.f32 %v2508_v13 }
 0xa6d   :  { %v1992_v14 = vpop.eup %1991 }
 0xa6e   :  { %815 = vrot.lane.b32.xlu0 %v1992_v14, %s2188_s17 }
 0xa70   :  { %v1994_v15 = vpop.eup %1993 }
 0xa71   :  { %741 = vrot.lane.b32.xlu1 %v1994_v15, %s2188_s17 }
 0xae0   :  { %v816_v16 = vpop.permute.xlu0 %815 }
 0xae1   :  { %v818_v17 = vmul.f32 %v1988_v61, %v816_v16 }
 0xae3   :  { %v742_v18 = vpop.permute.xlu1 %741  ;;  %820 = vrot.lane.b32.xlu1 %v818_v17, %s2194_s10  ;;  %v898_v20 = vpack.c.bf16 %v818_v17, %v818_v17  ;;  %v205_v17 = vadd.f32 %v2348_v8, %v2392_v46 }
 0xae4   :  { %v744_v19 = vmul.f32 %v1990_v63, %v742_v18 }
 0xae6   :  { %824 = vrot.lane.b32.xlu0 %v744_v19, %s2188_s17 }
 0xae7   :  { %900 = vrot.lane.b32.xlu1 %v898_v20, %s2194_s10 }
 0xb55   :  { %v821_v21 = vpop.permute.xlu1 %820 }
 0xb58   :  { %v825_v22 = vpop.permute.xlu0 %824 }
 0xb59   :  { %v827_v23 = vsel %vm90_vm0, %v821_v21, %v825_v22  ;;  %v901_v24 = vpop.permute.xlu1 %900 }
 0xb5a   :  { %v828_v25 = vpack.c.bf16 %v827_v23, %v827_v23  ;;  %1827 = vmatmul.mubr.msk.bf16.vlgmr.msra.gmra.mrb[20].mxu0 %vm90_vm0, %v901_v24 }
 0xb5b   :  { %1831 = vmatpush3.bf16.msra.mxu0 %v2363_v31  ;;  %1838 = vmatprep.mubr.msk.bf16.mxu0 %vm2193_vm1, %v2192_v0 }
 0xb5c   :  { %1819 = vmatmul.mubr.msk.bf16.vlgmr.msra.gmra.mrb[16].mxu1 %vm371_vm3, %v828_v25  ;;  %1832 = vmatprep.subr.bf16.mxu0 %v2192_v0 }
 0xb5d   :  { %1843 = vmatpush3.bf16.msra.mxu1 %v2327_v2  ;;  %1846 = vmatprep.mubr.msk.bf16.mxu1 %vm2193_vm1, %v2192_v0 }
 0xb5e   :  { %1844 = vmatprep.subr.bf16.mxu1 %v2192_v0 }
 0xb5f   :  { %1833 = vmatpush3.bf16.msra.mxu0 %v2367_v34 }
 0xb60   :  { %1834 = vmatprep.subr.bf16.mxu0 %v2192_v0 }
 0xb61   :  { %1845 = vmatpush3.bf16.msra.mxu1 %v2332_v5 }
 0xb62   :  { %1850 = vmatprep.subr.bf16.mxu1 %v2192_v0 }
 0xb63   :  { %1835 = vmatpush3.bf16.msra.mxu0 %v2374_v35 }
 0xb64   :  { %1836 = vmatprep.subr.bf16.mxu0 %v2192_v0 }
 0xb67   :  { %1837 = vmatpush3.bf16.msra.mxu0 %v2380_v37 }
 0xb68   :  { %1862 = vmatprep.subr.bf16.mxu0 %v2192_v0 }
 0xc2d   :  { %v939_v27 = vpop.f32.mrb[20].mxu0 }
 0xc2e   :  { %v945_v29 = vadd.f32 %v939_v27, %v202_v26  ;;  %v1828_v28 = vpop.f32.mrb[21].mxu0 }
 0xc2f   :  { %v866_v32 = vpop.f32.mrb[16].mxu1  ;;  %v942_v33 = vpop.f32.mrb[22].mxu0 }
 0xc30   :  { %1995 = vtanh.f32 %v945_v29  ;;  %v867_v36 = vadd.f32 %v2418_v59, %v866_v32  ;;  %v1820_v30 = vpop.f32.mrb[17].mxu1  ;;  %v1829_v38 = vpop.f32.mrb[23].mxu0  ;;  %v1641_v44 = vmul.f32 -1.442695, %v945_v29 }
 0xc31   :  { %v869_v39 = vpop.f32.mrb[18].mxu1 }
 0xc32   :  { %v1821_v40 = vpop.f32.mrb[19].mxu1  ;;  %1997 = vtanh.f32 %v867_v36  ;;  %v1639_v47 = vmul.f32 -1.442695, %v867_v36 }
 0xc33   :  { %1999 = vpow2.f32 %v1641_v44 }
 0xc34   :  { %2001 = vpow2.f32 %v1639_v47 }
 0xc3a   :  { %v1996_v41 = vpop.eup %1995 }
 0xc3b   :  { %955 = vrot.lane.b32.xlu1 %v1996_v41, %s2188_s17 }
 0xc3c   :  { %v1998_v42 = vpop.eup %1997 }
 0xc3d   :  { %881 = vrot.lane.b32.xlu0 %v1998_v42, %s2188_s17  ;;  %v2000_v48 = vpop.eup %1999 }
 0xc3e   :  { %v2002_v49 = vpop.eup %2001  ;;  %v949_v50 = vadd.f32 1.0, %v2000_v48 }
 0xc3f   :  { %v875_v51 = vadd.f32 1.0, %v2002_v49 }
 0xc40   :  { %2003 = vrcp.f32 %v949_v50 }
 0xc41   :  { %2005 = vrcp.f32 %v875_v51 }
 0xc4a   :  { %v2004_v52 = vpop.eup %2003 }
 0xc4b   :  { %v2006_v12 = vpop.eup %2005  ;;  %v953_v57 = vmul.f32 %v2004_v52, %v2504_v7 }
 0xc4c   :  { %v879_v61 = vmul.f32 %v2006_v12, %v2508_v13 }
 0xcad   :  { %v956_v53 = vpop.permute.xlu1 %955 }
 0xcae   :  { %v958_v54 = vmul.f32 %v2004_v52, %v956_v53 }
 0xcaf   :  { %v882_v55 = vpop.permute.xlu0 %881 }
 0xcb0   :  { %960 = vrot.lane.b32.xlu1 %v958_v54, %s2194_s10  ;;  %v884_v56 = vmul.f32 %v2006_v12, %v882_v55 }
 0xcb2   :  { %886 = vrot.lane.b32.xlu0 %v884_v56, %s2194_s10 }
 0xd22   :  { %v961_v58 = vpop.permute.xlu1 %960 }
 0xd23   :  { %v2543_v60 = vadd.f32 %v961_v58, %v953_v57 }
 0xd24   :  { %v887_v62 = vpop.permute.xlu0 %886 }
 0xd25   :  { %2007 = vtanh.f32 %v2543_v60  ;;  %v2547_v9 = vadd.f32 %v887_v62, %v879_v61 }
 0xd27   :  { %2009 = vtanh.f32 %v2547_v9 }
 0xd2f   :  { %v2008_v63 = vpop.eup %2007 }
 0xd30   :  { %966 = vrot.lane.b32.xlu1 %v2008_v63, %s2188_s17 }
 0xd31   :  { %v2010_v1 = vpop.eup %2009 }
 0xd32   :  { %892 = vrot.lane.b32.xlu0 %v2010_v1, %s2188_s17 }
 0xda2   :  { %v967_v3 = vpop.permute.xlu1 %966 }
 0xda3   :  { %v969_v4 = vmul.f32 %v2004_v52, %v967_v3 }
 0xda4   :  { %v893_v6 = vpop.permute.xlu0 %892 }
 0xda5   :  { %971 = vrot.lane.b32.xlu0 %v969_v4, %s2194_s10  ;;  %v895_v7 = vmul.f32 %v2006_v12, %v893_v6  ;;  %v1049_v10 = vpack.c.bf16 %v969_v4, %v969_v4 }
 0xda7   :  { %975 = vrot.lane.b32.xlu1 %v895_v7, %s2188_s17 }
 0xda9   :  { %1051 = vrot.lane.b32.xlu0 %v1049_v10, %s2194_s10 }
 0xe17   :  { %v972_v11 = vpop.permute.xlu0 %971 }
 0xe19   :  { %v976_v13 = vpop.permute.xlu1 %975 }
 0xe1a   :  { %v978_v14 = vsel %vm90_vm0, %v972_v11, %v976_v13 }
 0xe1b   :  { %v1052_v15 = vpop.permute.xlu0 %1051  ;;  %v979_v16 = vpack.c.bf16 %v978_v14, %v978_v14 }
 0xe1c   :  { %1847 = vmatmul.mubr.msk.bf16.vlgmr.msra.gmra.mrb[20].mxu1 %vm90_vm0, %v1052_v15 }
 0xe1d   :  { %1851 = vmatpush3.bf16.msra.mxu1 %v2363_v31  ;;  %1858 = vmatprep.mubr.msk.bf16.mxu1 %vm2193_vm1, %v2192_v0 }
 0xe1e   :  { %1839 = vmatmul.mubr.msk.bf16.vlgmr.msra.gmra.mrb[24].mxu0 %vm371_vm3, %v979_v16  ;;  %1852 = vmatprep.subr.bf16.mxu1 %v2192_v0 }
 0xe1f   :  { %1863 = vmatpush3.bf16.msra.mxu0 %v2327_v2  ;;  %1866 = vmatprep.mubr.msk.bf16.mxu0 %vm2193_vm1, %v2192_v0 }
 0xe20   :  { %1864 = vmatprep.subr.bf16.mxu0 %v2192_v0 }
 0xe21   :  { %1853 = vmatpush3.bf16.msra.mxu1 %v2367_v34 }
 0xe22   :  { %1854 = vmatprep.subr.bf16.mxu1 %v2192_v0 }
 0xe23   :  { %1865 = vmatpush3.bf16.msra.mxu0 %v2332_v5 }
 0xe24   :  { %1870 = vmatprep.subr.bf16.mxu0 %v2192_v0 }
 0xe25   :  { %1855 = vmatpush3.bf16.msra.mxu1 %v2374_v35 }
 0xe26   :  { %1856 = vmatprep.subr.bf16.mxu1 %v2192_v0 }
 0xe29   :  { %1857 = vmatpush3.bf16.msra.mxu1 %v2380_v37 }
 0xe2a   :  { %1882 = vmatprep.subr.bf16.mxu1 %v2192_v0 }
 0xeef   :  { %v1090_v18 = vpop.f32.mrb[20].mxu1 }
 0xef0   :  { %v1096_v19 = vadd.f32 %v1090_v18, %v205_v17  ;;  %v1848_v20 = vpop.f32.mrb[21].mxu1 }
 0xef1   :  { %v1017_v21 = vpop.f32.mrb[24].mxu0  ;;  %v1093_v22 = vpop.f32.mrb[22].mxu1 }
 0xef2   :  { %2011 = vtanh.f32 %v1096_v19  ;;  %v1018_v23 = vadd.f32 %v2418_v59, %v1017_v21  ;;  %v1840_v24 = vpop.f32.mrb[25].mxu0  ;;  %v1849_v25 = vpop.f32.mrb[23].mxu1  ;;  %v1645_v46 = vmul.f32 -1.442695, %v1096_v19 }
 0xef3   :  { %v1020_v26 = vpop.f32.mrb[26].mxu0 }
 0xef4   :  { %v1841_v27 = vpop.f32.mrb[27].mxu0  ;;  %2013 = vtanh.f32 %v1018_v23  ;;  %v1643_v32 = vmul.f32 -1.442695, %v1018_v23 }
 0xef5   :  { %2015 = vpow2.f32 %v1645_v46 }
 0xef6   :  { %2017 = vpow2.f32 %v1643_v32 }
 0xefc   :  { %v2012_v29 = vpop.eup %2011 }
 0xefd   :  { %1106 = vrot.lane.b32.xlu0 %v2012_v29, %s2188_s17 }
 0xefe   :  { %v2014_v28 = vpop.eup %2013 }
 0xeff   :  { %1032 = vrot.lane.b32.xlu1 %v2014_v28, %s2188_s17  ;;  %v2016_v33 = vpop.eup %2015 }
 0xf00   :  { %v2018_v36 = vpop.eup %2017  ;;  %v1100_v30 = vadd.f32 1.0, %v2016_v33 }
 0xf01   :  { %v1026_v38 = vadd.f32 1.0, %v2018_v36 }
 0xf02   :  { %2019 = vrcp.f32 %v1100_v30 }
 0xf03   :  { %2021 = vrcp.f32 %v1026_v38 }
 0xf0c   :  { %v2020_v39 = vpop.eup %2019 }
 0xf0d   :  { %v2022_v42 = vpop.eup %2021  ;;  %v1104_v48 = vmul.f32 %v2020_v39, %v2543_v60 }
 0xf0e   :  { %v1030_v51 = vmul.f32 %v2022_v42, %v2547_v9 }
 0xf6f   :  { %v1107_v40 = vpop.permute.xlu0 %1106 }
 0xf70   :  { %v1109_v41 = vmul.f32 %v2020_v39, %v1107_v40 }
 0xf71   :  { %v1033_v44 = vpop.permute.xlu1 %1032 }
 0xf72   :  { %1111 = vrot.lane.b32.xlu0 %v1109_v41, %s2194_s10  ;;  %v1035_v47 = vmul.f32 %v2022_v42, %v1033_v44 }
 0xf74   :  { %1037 = vrot.lane.b32.xlu1 %v1035_v47, %s2194_s10 }
 0xfe4   :  { %v1112_v49 = vpop.permute.xlu0 %1111 }
 0xfe5   :  { %v2582_v50 = vadd.f32 %v1112_v49, %v1104_v48 }
 0xfe6   :  { %v1038_v52 = vpop.permute.xlu1 %1037 }
 0xfe7   :  { %2023 = vtanh.f32 %v2582_v50  ;;  %v2586_v53 = vadd.f32 %v1038_v52, %v1030_v51 }
 0xfe9   :  { %2025 = vtanh.f32 %v2586_v53 }
 0xff1   :  { %v2024_v54 = vpop.eup %2023 }
 0xff2   :  { %1117 = vrot.lane.b32.xlu0 %v2024_v54, %s2188_s17 }
 0xff3   :  { %v2026_v12 = vpop.eup %2025 }
 0xff4   :  { %1043 = vrot.lane.b32.xlu1 %v2026_v12, %s2188_s17 }
0x1064   :  { %v1118_v55 = vpop.permute.xlu0 %1117 }
0x1065   :  { %v1120_v56 = vmul.f32 %v2020_v39, %v1118_v55 }
0x1066   :  { %v1044_v57 = vpop.permute.xlu1 %1043 }
0x1067   :  { %1122 = vrot.lane.b32.xlu1 %v1120_v56, %s2194_s10  ;;  %v1046_v58 = vmul.f32 %v2022_v42, %v1044_v57  ;;  %v1200_v60 = vpack.c.bf16 %v1120_v56, %v1120_v56 }
0x1069   :  { %1126 = vrot.lane.b32.xlu0 %v1046_v58, %s2188_s17 }
0x106b   :  { %1202 = vrot.lane.b32.xlu1 %v1200_v60, %s2194_s10 }
0x10d9   :  { %v1123_v61 = vpop.permute.xlu1 %1122 }
0x10db   :  { %v1127_v62 = vpop.permute.xlu0 %1126 }
0x10dc   :  { %v1129_v9 = vsel %vm90_vm0, %v1123_v61, %v1127_v62 }
0x10dd   :  { %v1203_v63 = vpop.permute.xlu1 %1202  ;;  %v1130_v1 = vpack.c.bf16 %v1129_v9, %v1129_v9 }
0x10de   :  { %1867 = vmatmul.mubr.msk.bf16.vlgmr.msra.gmra.mrb[28].mxu0 %vm90_vm0, %v1203_v63 }
0x10df   :  { %1871 = vmatpush3.bf16.msra.mxu0 %v2363_v31  ;;  %1878 = vmatprep.mubr.msk.bf16.mxu0 %vm2193_vm1, %v2192_v0 }
0x10e0   :  { %1859 = vmatmul.mubr.msk.bf16.vlgmr.msra.gmra.mrb[24].mxu1 %vm371_vm3, %v1130_v1  ;;  %1872 = vmatprep.subr.bf16.mxu0 %v2192_v0 }
0x10e1   :  { %1883 = vmatpush3.bf16.msra.mxu1 %v2327_v2  ;;  %1886 = vmatprep.mubr.msk.bf16.mxu1 %vm2193_vm1, %v2192_v0  ;;  %v210_v2 = vadd.f32 %v2386_v43, %v2348_v8 }
0x10e2   :  { %1884 = vmatprep.subr.bf16.mxu1 %v2192_v0 }
0x10e3   :  { %1873 = vmatpush3.bf16.msra.mxu0 %v2367_v34 }
0x10e4   :  { %1874 = vmatprep.subr.bf16.mxu0 %v2192_v0 }
0x10e5   :  { %1885 = vmatpush3.bf16.msra.mxu1 %v2332_v5 }
0x10e6   :  { %1890 = vmatprep.subr.bf16.mxu1 %v2192_v0 }
0x10e7   :  { %1875 = vmatpush3.bf16.msra.mxu0 %v2374_v35 }
0x10e8   :  { %1876 = vmatprep.subr.bf16.mxu0 %v2192_v0 }
0x10eb   :  { %1877 = vmatpush3.bf16.msra.mxu0 %v2380_v37 }
0x10ec   :  { %1902 = vmatprep.subr.bf16.mxu0 %v2192_v0 }
0x11b1   :  { %v1241_v3 = vpop.f32.mrb[28].mxu0 }
0x11b2   :  { %v1247_v4 = vadd.f32 %v1241_v3, %v210_v2  ;;  %v1868_v6 = vpop.f32.mrb[29].mxu0 }
0x11b3   :  { %v1168_v7 = vpop.f32.mrb[24].mxu1  ;;  %v1244_v10 = vpop.f32.mrb[30].mxu0 }
0x11b4   :  { %v1169_v5 = vadd.f32 %v2418_v59, %v1168_v7  ;;  %2027 = vtanh.f32 %v1247_v4  ;;  %v1860_v11 = vpop.f32.mrb[25].mxu1  ;;  %v1869_v13 = vpop.f32.mrb[31].mxu0  ;;  %v1649_v8 = vmul.f32 -1.442695, %v1247_v4 }
0x11b5   :  { %v1171_v14 = vpop.f32.mrb[26].mxu1 }
0x11b6   :  { %2029 = vtanh.f32 %v1169_v5  ;;  %v1861_v15 = vpop.f32.mrb[27].mxu1  ;;  %v1647_v43 = vmul.f32 -1.442695, %v1169_v5 }
0x11b7   :  { %2031 = vpow2.f32 %v1649_v8 }
0x11b8   :  { %2033 = vpow2.f32 %v1647_v43 }
0x11be   :  { %v2028_v16 = vpop.eup %2027 }
0x11bf   :  { %1257 = vrot.lane.b32.xlu1 %v2028_v16, %s2188_s17 }
0x11c0   :  { %v2030_v17 = vpop.eup %2029 }
0x11c1   :  { %1183 = vrot.lane.b32.xlu0 %v2030_v17, %s2188_s17  ;;  %v2032_v18 = vpop.eup %2031 }
0x11c2   :  { %v2034_v19 = vpop.eup %2033  ;;  %v1251_v20 = vadd.f32 1.0, %v2032_v18 }
0x11c3   :  { %v1177_v21 = vadd.f32 1.0, %v2034_v19 }
0x11c4   :  { %2035 = vrcp.f32 %v1251_v20 }
0x11c5   :  { %2037 = vrcp.f32 %v1177_v21 }
0x11ce   :  { %v2036_v22 = vpop.eup %2035 }
0x11cf   :  { %v2038_v25 = vpop.eup %2037  ;;  %v1255_v29 = vmul.f32 %v2036_v22, %v2582_v50 }
0x11d0   :  { %v1181_v32 = vmul.f32 %v2038_v25, %v2586_v53 }
0x1231   :  { %v1258_v23 = vpop.permute.xlu1 %1257 }
0x1232   :  { %v1260_v24 = vmul.f32 %v2036_v22, %v1258_v23 }
0x1233   :  { %v1184_v26 = vpop.permute.xlu0 %1183 }
0x1234   :  { %v1186_v27 = vmul.f32 %v2038_v25, %v1184_v26  ;;  %1262 = vrot.lane.b32.xlu1 %v1260_v24, %s2194_s10 }
0x1236   :  { %1188 = vrot.lane.b32.xlu0 %v1186_v27, %s2194_s10 }
0x12a6   :  { %v1263_v28 = vpop.permute.xlu1 %1262 }
0x12a7   :  { %v2621_v46 = vadd.f32 %v1263_v28, %v1255_v29 }
0x12a8   :  { %v1189_v33 = vpop.permute.xlu0 %1188 }
0x12a9   :  { %2039 = vtanh.f32 %v2621_v46  ;;  %v2625_v36 = vadd.f32 %v1189_v33, %v1181_v32 }
0x12ab   :  { %2041 = vtanh.f32 %v2625_v36 }
0x12b3   :  { %v2040_v30 = vpop.eup %2039 }
0x12b4   :  { %1268 = vrot.lane.b32.xlu1 %v2040_v30, %s2188_s17 }
0x12b5   :  { %v2042_v38 = vpop.eup %2041 }
0x12b6   :  { %1194 = vrot.lane.b32.xlu0 %v2042_v38, %s2188_s17 }
0x1326   :  { %v1269_v39 = vpop.permute.xlu1 %1268 }
0x1327   :  { %v1271_v40 = vmul.f32 %v2036_v22, %v1269_v39 }
0x1328   :  { %v1195_v41 = vpop.permute.xlu0 %1194 }
0x1329   :  { %v1197_v42 = vmul.f32 %v2038_v25, %v1195_v41  ;;  %1273 = vrot.lane.b32.xlu0 %v1271_v40, %s2194_s10  ;;  %v1351_v44 = vpack.c.bf16 %v1271_v40, %v1271_v40 }
0x132b   :  { %1277 = vrot.lane.b32.xlu1 %v1197_v42, %s2188_s17 }
0x132d   :  { %1353 = vrot.lane.b32.xlu0 %v1351_v44, %s2194_s10  ;;  %v1937_v44 = vld [vmem:[%s2703_s6] sm:$0xff]  }
0x139b   :  { %v1274_v47 = vpop.permute.xlu0 %1273 }
0x139d   :  { %v1278_v48 = vpop.permute.xlu1 %1277 }
0x139e   :  { %v1280_v49 = vsel %vm90_vm0, %v1274_v47, %v1278_v48  ;;  %v1938_v47 = vld [vmem:[%s2703_s6 + $0x8] sm:$0xff]  }
0x139f   :  { %v1281_v50 = vpack.c.bf16 %v1280_v49, %v1280_v49  ;;  %v1354_v51 = vpop.permute.xlu0 %1353 }
0x13a0   :  { %1887 = vmatmul.mubr.msk.bf16.vlgmr.msra.gmra.mrb[28].mxu1 %vm90_vm0, %v1354_v51 }
0x13a1   :  { %1879 = vmatmul.mubr.msk.bf16.vlgmr.msra.gmra.mrb[32].mxu0 %vm371_vm3, %v1281_v50  ;;  %1891 = vmatpush3.bf16.msra.mxu1 %v2363_v31  ;;  %v2067_v31 = vld [vmem:[%s2700_s3] ss:$0 sm:$0xff] }
0x13a2   :  { %1892 = vmatprep.subr.bf16.mxu1 %v2192_v0  ;;  %1898 = vmatprep.mubr.msk.bf16.mxu1 %vm2193_vm1, %v2192_v0  ;;  %v213_v52 = vadd.f32 %v2067_v31, %v2390_v45 }
0x13a3   :  { %1906 = vmatprep.mubr.msk.bf16.mxu0 %vm2193_vm1, %v2192_v0  ;;  %1903 = vmatpush3.bf16.msra.mxu0 %v1937_v44 }
0x13a4   :  { %1904 = vmatprep.subr.bf16.mxu0 %v2192_v0 }
0x13a5   :  { %1893 = vmatpush3.bf16.msra.mxu1 %v2367_v34 }
0x13a6   :  { %1894 = vmatprep.subr.bf16.mxu1 %v2192_v0 }
0x13a7   :  { %1905 = vmatpush3.bf16.msra.mxu0 %v1938_v47 }
0x13a9   :  { %1895 = vmatpush3.bf16.msra.mxu1 %v2374_v35 }
0x13aa   :  { %1896 = vmatprep.subr.bf16.mxu1 %v2192_v0 }
0x13ad   :  { %1897 = vmatpush3.bf16.msra.mxu1 %v2380_v37 }
0x1473   :  { %v1392_v53 = vpop.f32.mrb[28].mxu1 }
0x1474   :  { %v1319_v54 = vpop.f32.mrb[32].mxu0  ;;  %v1398_v12 = vadd.f32 %v1392_v53, %v213_v52  ;;  %v1888_v55 = vpop.f32.mrb[29].mxu1 }
0x1475   :  { %v1320_v34 = vadd.f32 %v2418_v59, %v1319_v54  ;;  %v1880_v56 = vpop.f32.mrb[33].mxu0  ;;  %v1395_v57 = vpop.f32.mrb[30].mxu1  ;;  %v1656_v54 = vld [vmem:[%s2704_s7] ss:$0 sm:$0xff] }
0x1476   :  { %2043 = vtanh.f32 %v1398_v12  ;;  %v1322_v35 = vpop.f32.mrb[34].mxu0  ;;  %v1889_v58 = vpop.f32.mrb[31].mxu1  ;;  %v1653_v45 = vmul.f32 -1.442695, %v1398_v12 }
0x1477   :  { %2045 = vtanh.f32 %v1320_v34  ;;  %v1881_v60 = vpop.f32.mrb[35].mxu0  ;;  %v1651_v62 = vmul.f32 -1.442695, %v1320_v34 }
0x1478   :  { %2047 = vpow2.f32 %v1653_v45 }
0x1479   :  { %2049 = vpow2.f32 %v1651_v62 }
0x1480   :  { %v2044_v37 = vpop.eup %2043 }
0x1481   :  { %v2046_v61 = vpop.eup %2045  ;;  %1408 = vrot.lane.b32.xlu0 %v2044_v37, %s2188_s17 }
0x1482   :  { %1334 = vrot.lane.b32.xlu1 %v2046_v61, %s2188_s17  ;;  %v2048_v9 = vpop.eup %2047 }
0x1483   :  { %v2050_v63 = vpop.eup %2049  ;;  %v1402_v1 = vadd.f32 1.0, %v2048_v9 }
0x1484   :  { %v1328_v2 = vadd.f32 1.0, %v2050_v63 }
0x1485   :  { %2051 = vrcp.f32 %v1402_v1 }
0x1486   :  { %2053 = vrcp.f32 %v1328_v2 }
0x148f   :  { %v2052_v3 = vpop.eup %2051 }
0x1490   :  { %v2054_v6 = vpop.eup %2053  ;;  %v1406_v11 = vmul.f32 %v2052_v3, %v2621_v46 }
0x1491   :  { %v1332_v13 = vmul.f32 %v2054_v6, %v2625_v36 }
0x14f3   :  { %v1409_v4 = vpop.permute.xlu0 %1408 }
0x14f4   :  { %v1335_v7 = vpop.permute.xlu1 %1334  ;;  %v1411_v10 = vmul.f32 %v2052_v3, %v1409_v4 }
0x14f5   :  { %v1337_v5 = vmul.f32 %v2054_v6, %v1335_v7 }
0x14f6   :  { %1413 = vrot.lane.b32.xlu0 %v1411_v10, %s2194_s10 }
0x14f7   :  { %1339 = vrot.lane.b32.xlu1 %v1337_v5, %s2194_s10 }
0x1568   :  { %v1414_v14 = vpop.permute.xlu0 %1413 }
0x1569   :  { %v1340_v15 = vpop.permute.xlu1 %1339  ;;  %v1416_v16 = vadd.f32 %v1414_v14, %v1406_v11 }
0x156a   :  { %v1342_v17 = vadd.f32 %v1340_v15, %v1332_v13 }
0x156b   :  { %2055 = vtanh.f32 %v1416_v16 }
0x156c   :  { %2057 = vtanh.f32 %v1342_v17 }
0x1575   :  { %v2056_v8 = vpop.eup %2055 }
0x1576   :  { %v2058_v43 = vpop.eup %2057  ;;  %1419 = vrot.lane.b32.xlu0 %v2056_v8, %s2188_s17 }
0x1577   :  { %1345 = vrot.lane.b32.xlu1 %v2058_v43, %s2188_s17 }
0x15e8   :  { %v1420_v18 = vpop.permute.xlu0 %1419 }
0x15e9   :  { %v1346_v19 = vpop.permute.xlu1 %1345  ;;  %v1422_v20 = vmul.f32 %v2052_v3, %v1420_v18 }
0x15ea   :  { %v1348_v21 = vmul.f32 %v2054_v6, %v1346_v19 }
0x15eb   :  { %1424 = vrot.lane.b32.xlu1 %v1422_v20, %s2194_s10 }
0x15ec   :  { %1428 = vrot.lane.b32.xlu0 %v1348_v21, %s2188_s17 }
0x165d   :  { %v1425_v22 = vpop.permute.xlu1 %1424 }
0x165e   :  { %v1429_v23 = vpop.permute.xlu0 %1428  ;;  %1500 = vst.msk [vmem:[#allocation3] sm:$0xff] %vm90_vm0, %v1425_v22 }
0x165f   :  { %v1431_v24 = vsel %vm90_vm0, %v1425_v22, %v1429_v23 }
0x1660   :  { %v1432_v25 = vpack.c.bf16 %v1431_v24, %v1431_v24 }
0x1662   :  { %1899 = vmatmul.mubr.msk.bf16.vlgmr.msra.gmra.mrb[32].mxu1 %vm371_vm3, %v1432_v25 }
0x1735   :  { %v1470_v26 = vpop.f32.mrb[32].mxu1 }
0x1736   :  { %v1471_v27 = vadd.f32 %v2418_v59, %v1470_v26  ;;  %v1900_v29 = vpop.f32.mrb[33].mxu1 }
0x1737   :  { %v1473_v28 = vpop.f32.mrb[34].mxu1 }
0x1738   :  { %2059 = vtanh.f32 %v1471_v27  ;;  %v1901_v46 = vpop.f32.mrb[35].mxu1  ;;  %v1655_v33 = vmul.f32 -1.442695, %v1471_v27 }
0x173a   :  { %2061 = vpow2.f32 %v1655_v33 }
0x1742   :  { %v2060_v32 = vpop.eup %2059 }
0x1743   :  { %1485 = vrot.lane.b32.xlu1 %v2060_v32, %s2188_s17 }
0x1744   :  { %v2062_v36 = vpop.eup %2061 }
0x1745   :  { %v1479_v30 = vadd.f32 1.0, %v2062_v36 }
0x1747   :  { %2063 = vrcp.f32 %v1479_v30 }
0x1751   :  { %v2064_v38 = vpop.eup %2063 }
0x1752   :  { %v1483_v41 = vmul.f32 %v2064_v38, %v1342_v17 }
0x17b5   :  { %v1486_v39 = vpop.permute.xlu1 %1485 }
0x17b6   :  { %v1488_v40 = vmul.f32 %v2064_v38, %v1486_v39 }
0x17b8   :  { %1490 = vrot.lane.b32.xlu0 %v1488_v40, %s2194_s10 }
0x182a   :  { %v1491_v42 = vpop.permute.xlu0 %1490 }
0x182b   :  { %v1493_v59 = vadd.f32 %v1491_v42, %v1483_v41 }
0x182d   :  { %2065 = vtanh.f32 %v1493_v59 }
0x1837   :  { %v2066_v48 = vpop.eup %2065 }
0x1838   :  { %1496 = vrot.lane.b32.xlu1 %v2066_v48, %s2188_s17 }
0x183c   :  { %1502 = vrot.lane.b32.xlu1 %v1416_v16, %s2195_s19 }
0x1840   :  { %1512 = vrot.lane.b32.xlu1 %v1493_v59, %s2195_s19 }
0x18aa   :  { %v1497_v49 = vpop.permute.xlu1 %1496 }
0x18ab   :  { %v1499_v50 = vmul.f32 %v2064_v38, %v1497_v49 }
0x18ad   :  { %v1519_v51 = vpack.c.bf16 %v1499_v50, %v1499_v50 }
0x18ae   :  { %v1503_v31 = vpop.permute.xlu1 %1502 }
0x18af   :  { %1505 = vst.msk [vmem:[#allocation3 + $0x8] sm:$0xff] %vm90_vm0, %v1503_v31  ;;  %1532 = vrot.lane.b32.xlu0 %v1519_v51, %s2194_s10 }
0x18b2   :  { %v1513_v52 = vpop.permute.xlu1 %1512 }
0x18b3   :  { %1515 = vst.msk [vmem:[#allocation3 + $0x18] sm:$0xff] %vm90_vm0, %v1513_v52  ;;  %1507 = vrot.lane.b32.xlu0 %v1499_v50, %s2194_s10 }
0x1921   :  { %v1533_v0 = vpop.permute.xlu0 %1532 }
0x1922   :  { %1907 = vmatmul.mubr.msk.bf16.vlgmr.msra.gmra.mrb[36].mxu0 %vm90_vm0, %v1533_v0 }
0x1925   :  { %v1508_v53 = vpop.permute.xlu0 %1507 }
0x1926   :  { %1510 = vst.msk [vmem:[#allocation3 + $0x10] sm:$0xff] %vm90_vm0, %v1508_v53 }
0x19f5   :  { %v1583_v12 = vpop.f32.mrb[36].mxu0 }
0x19f6   :  { %v1584_v55 = vadd.f32 %v1656_v54, %v1583_v12  ;;  %v1908_v34 = vpop.f32.mrb[37].mxu0 }
0x19f7   :  { %v1586_v56 = vpop.f32.mrb[38].mxu0 }
0x19f8   :  { %1589 = vst [vmem:[#allocation12] sm:$0xff] %v1584_v55  ;;  %v1909_v57 = vpop.f32.mrb[39].mxu0 }
0x19f9   :  { %2167 = shalt.err (!%p2164_p8)
}
0x19fa   :  { %s2168_s7 = scalar_lea.hbm %s2705_s8, 128 }
0x19fb   :  { %p2169_p9 = scmp.ne.s32.totalorder %s2705_s8, %s2168_s7  ;;  %p2172_p10 = scmp.lt.u32.totalorder %s2168_s7, %s2705_s8 }
0x19fd   :  { %p2174_p11 = pnand %p2172_p10, %p2169_p9 }
0x19ff   :  { %2177 = shalt.err (!%p2174_p11)
}
0x1a00   :  { %1599 = dma.vmem_to_hbm [thread:$0]  %s1597_s21, 128, %s2705_s8, [#allocation6]  }
0x1a01   :  { %2184 = dma.done.wait [#allocation6], 128  }
0x1a02   :  { %2185 = vsyncadd [#allocation6], 4294967168 }
0x1a03   :  { %1603 = vsyncpa [#allocation5], 1 }
0x1a04   :  { %1604 = vsyncpa [#allocation8], 1 }
0x1a05   :  { %1605 = vsyncpa [#allocation11], 1 }
0x1a06   :  { %1606 = vsyncpa [#allocation6], 1 }

</bundles_post_ra>
